<compile_context>
chip_gen: v7x
topology: tpu7x:2x2x1
jax: 0.10.0
libtpu: 0.0.40
codegen_flags: <defaults>
</compile_context>

<pallas_src>
import jax
import jax.numpy as jnp
from jax.experimental import pallas as pl
from jax.experimental.pallas import tpu as pltpu


def _make_abmil_kernel(m_actual, tm, n_tiles):
    """Builds the tiled ABMIL kernel body (m_actual/tm/n_tiles are static Python ints)."""

    def kernel(x_ref, v_w_ref, v_b_ref, w_row_ref, w_b_ref,
               a_raw_ref, m_ref, l_ref, z_ref):
        i = pl.program_id(0)

        @pl.when(i == 0)
        def _init():
            m_ref[...] = jnp.full_like(m_ref, -jnp.inf)   # running max
            l_ref[...] = jnp.zeros_like(l_ref)            # running softmax denom
            z_ref[...] = jnp.zeros_like(z_ref)            # un-normalized pooled feature

        x = x_ref[...]                                    # [tm, D], compute dtype

        # Attention MLP: H = tanh(X @ V + b_v)            [tm, hidden], f32 accumulation.
        h = jnp.tanh(
            jnp.dot(x, v_w_ref[...], preferred_element_type=jnp.float32)
            + v_b_ref[...]
        )

        # Attention logits as a lane-dense row: a = w_row @ H^T + b_w   [1, tm]
        a_row = jax.lax.dot_general(
            w_row_ref[...], h, (((1,), (1,)), ((), ())),
            preferred_element_type=jnp.float32,
        ) + w_b_ref[...]

        # Mask padded instances (M not a multiple of tm) to -inf so they drop out of
        # the softmax denominator and the pooled feature.
        col = jax.lax.broadcasted_iota(jnp.int32, (1, tm), 1) + i * tm
        a_row = jnp.where(col < m_actual, a_row, -jnp.inf)

        # Stream raw (unnormalized) logits of this tile straight back to HBM.
        a_raw_ref[...] = a_row

        # Online softmax update + MXU pooling accumulation (all into resident outputs).
        m_prev = m_ref[...]                                               # [1, 1]
        m_new = jnp.maximum(m_prev, jnp.max(a_row, axis=1, keepdims=True))
        alpha = jnp.exp(m_prev - m_new)                                   # [1, 1]
        p = jnp.exp(a_row - m_new)                                        # [1, tm]
        l_ref[...] = alpha * l_ref[...] + jnp.sum(p, axis=1, keepdims=True)
        z_ref[...] = alpha * z_ref[...] + jnp.dot(
            p.astype(x.dtype), x, preferred_element_type=jnp.float32)     # [1, D]
        m_ref[...] = m_new

    return kernel


def abmil_forward(x, params, *, tm=512, compute_dtype=jnp.float32,
                  vmem_limit_bytes=None):
    """x: [M, D] float32. params: dict of pre-transposed ([in, out]) weights/biases."""
    M, D = x.shape
    hidden = params["attn_V_w"].shape[1]

    # Clamp the tile to the (128-rounded) bag size so small bags don't over-pad.
    tm = max(128, min(int(tm), ((M + 127) // 128) * 128))
    n_tiles = int(pl.cdiv(M, tm))
    m_pad = n_tiles * tm

    # Stream X (and V) in compute_dtype from the wrapper — no per-tile in-kernel casts.
    x_in = x.astype(compute_dtype)
    if m_pad != M:
        x_in = jnp.pad(x_in, ((0, m_pad - M), (0, 0)))
    v_w = params["attn_V_w"].astype(compute_dtype)      # [D, hidden]
    w_row = params["attn_w_w"].T                        # [1, hidden] (f32)

    kernel = _make_abmil_kernel(M, tm, n_tiles)

    def const_spec(shape):
        # Constant block index => fetched from HBM once, VMEM-resident across all tiles.
        return pl.BlockSpec(shape, lambda i: (0, 0))

    grid_spec = pltpu.PrefetchScalarGridSpec(
        num_scalar_prefetch=0,
        grid=(n_tiles,),
        in_specs=[
            pl.BlockSpec((tm, D), lambda i: (i, 0)),   # X tile (double-buffered DMA)
            const_spec((D, hidden)),                   # attention V weight
            const_spec((1, hidden)),                   # attention V bias
            const_spec((1, hidden)),                   # attention w (as a row)
            const_spec((1, 1)),                        # attention w bias
        ],
        out_specs=(
            pl.BlockSpec((1, tm), lambda i: (0, i)),   # raw logits, streamed per tile
            pl.BlockSpec((1, 1), lambda i: (0, 0)),    # final running max
            pl.BlockSpec((1, 1), lambda i: (0, 0)),    # final softmax denom
            pl.BlockSpec((1, D), lambda i: (0, 0)),    # un-normalized pooled feature
        ),
    )

    itemsize = jnp.dtype(compute_dtype).itemsize
    bytes_accessed = int(
        m_pad * D * itemsize                            # X stream (dominant)
        + D * hidden * itemsize + (2 * hidden + 1) * 4  # weights/biases
        + (m_pad + 2 + D) * 4                           # outputs
    )
    cost = pl.CostEstimate(
        flops=int(2 * m_pad * D * hidden + 2 * m_pad * hidden + 2 * m_pad * D),
        transcendentals=int(m_pad * hidden + 2 * m_pad),
        bytes_accessed=bytes_accessed,
    )

    a_raw, m_fin, l_fin, z_unnorm = pl.pallas_call(
        kernel,
        out_shape=(
            jax.ShapeDtypeStruct((1, m_pad), jnp.float32),
            jax.ShapeDtypeStruct((1, 1), jnp.float32),
            jax.ShapeDtypeStruct((1, 1), jnp.float32),
            jax.ShapeDtypeStruct((1, D), jnp.float32),
        ),
        grid_spec=grid_spec,
        compiler_params=pltpu.CompilerParams(
            dimension_semantics=("arbitrary",),        # global softmax over the M axis
            vmem_limit_bytes=vmem_limit_bytes,
        ),
        cost_estimate=cost,
    )(x_in, v_w, params["attn_V_b"], w_row, params["attn_w_b"])

    # Finish softmax normalization and the classifier head in the wrapper (XLA).
    inv_l = 1.0 / l_fin[0, 0]
    a_norm = (jnp.exp(a_raw[0, :M] - m_fin[0, 0]) * inv_l).reshape(M, 1)
    z = z_unnorm * inv_l                                               # [1, D]
    logits = jnp.dot(z, params["cls_w"],
                     preferred_element_type=jnp.float32) + params["cls_b"]
    return logits, a_norm


def init_params(key, input_dim, hidden_dim, n_classes):
    """Deterministic synthetic parameters (PyTorch Linear shapes, stored as [in, out])."""
    ks = jax.random.split(key, 6)
    scale = 0.02
    return {
        "attn_V_w": scale * jax.random.normal(ks[0], (input_dim, hidden_dim), jnp.float32),
        "attn_V_b": scale * jax.random.normal(ks[1], (1, hidden_dim), jnp.float32),
        "attn_w_w": scale * jax.random.normal(ks[2], (hidden_dim, 1), jnp.float32),
        "attn_w_b": scale * jax.random.normal(ks[3], (1, 1), jnp.float32),
        "cls_w": scale * jax.random.normal(ks[4], (input_dim, n_classes), jnp.float32),
        "cls_b": scale * jax.random.normal(ks[5], (1, n_classes), jnp.float32),
    }


def abmil_ref(x, p, compute_dtype=jnp.float32):
    """Pure-JAX reference (same operand-precision policy as the kernel)."""
    xc = x.astype(compute_dtype)
    vw = p["attn_V_w"].astype(compute_dtype)
    h = jnp.tanh(jnp.dot(xc, vw, preferred_element_type=jnp.float32) + p["attn_V_b"])
    a = jnp.dot(h, p["attn_w_w"], preferred_element_type=jnp.float32) + p["attn_w_b"]
    a_norm = jax.nn.softmax(a, axis=0)
    z = jnp.dot(a_norm.T.astype(compute_dtype), xc, preferred_element_type=jnp.float32)
    logits = jnp.dot(z, p["cls_w"], preferred_element_type=jnp.float32) + p["cls_b"]
    return logits, a_norm


if __name__ == "__main__":
    # Shapes consistent with the module defaults (input_dim=320, hidden=64, n_classes=2).
    M, D, HIDDEN, N_CLASSES = 300, 320, 64, 2

    key = jax.random.PRNGKey(0)
    k_x, k_p = jax.random.split(key)
    x = jax.random.normal(k_x, (M, D), jnp.float32)
    params = init_params(k_p, D, HIDDEN, N_CLASSES)

    ref_logits, ref_a = abmil_ref(x, params, compute_dtype=jnp.float32)

    # f32 path, default (large) tile: single tile at M=300.
    logits, a_norm = abmil_forward(x, params, compute_dtype=jnp.float32)
    jax.block_until_ready((logits, a_norm))
    assert logits.shape == (1, N_CLASSES)
    assert a_norm.shape == (M, 1)
    assert jnp.allclose(logits, ref_logits, atol=2e-5, rtol=1e-4)
    assert jnp.allclose(a_norm, ref_a, atol=2e-6, rtol=1e-4)
    assert jnp.allclose(jnp.sum(a_norm), 1.0, atol=1e-5)

    # Multi-tile path (tm=128 -> 3 tiles) exercises the online softmax + padded-row mask.
    logits_mt, a_mt = abmil_forward(x, params, tm=128, compute_dtype=jnp.float32)
    jax.block_until_ready((logits_mt, a_mt))
    assert jnp.allclose(logits_mt, ref_logits, atol=2e-5, rtol=1e-4)
    assert jnp.allclose(a_mt, ref_a, atol=2e-6, rtol=1e-4)

    # bf16-streaming path (halves the dominant X HBM traffic), vs. the bf16 reference.
    logits_bf, a_bf = abmil_forward(x, params, compute_dtype=jnp.bfloat16)
    jax.block_until_ready((logits_bf, a_bf))
    ref_logits_bf, ref_a_bf = abmil_ref(x, params, compute_dtype=jnp.bfloat16)
    assert jnp.allclose(logits_bf, ref_logits_bf, atol=2e-3, rtol=1e-2)
    assert jnp.allclose(a_bf, ref_a_bf, atol=1e-4, rtol=1e-3)

    print("KERNEL_OK")
</pallas_src>

<mosaic_0001>
module attributes {stable_mosaic.version = 11 : i64} {
  func.func @kernel(%arg0: i32, %arg1: memref<384x320xf32, #tpu.memory_space<vmem>>, %arg2: memref<320x64xf32, #tpu.memory_space<vmem>>, %arg3: memref<1x64xf32, #tpu.memory_space<vmem>>, %arg4: memref<1x64xf32, #tpu.memory_space<vmem>>, %arg5: memref<1x1xf32, #tpu.memory_space<vmem>>, %arg6: memref<1x384xf32, #tpu.memory_space<vmem>>, %arg7: memref<1x1xf32, #tpu.memory_space<vmem>>, %arg8: memref<1x1xf32, #tpu.memory_space<vmem>>, %arg9: memref<1x320xf32, #tpu.memory_space<vmem>>) attributes {dimension_semantics = [#tpu.dimension_semantics<arbitrary>], iteration_bounds = array<i64: 1>, scalar_prefetch = 0 : i64, scratch_operands = 0 : i64, tpu.core_type = #tpu.core_type<tc>, window_params = [{transform_indices = @transform_0, window_bounds = array<i64: 384, 320>}, {pipeline_mode = #tpu.pipeline_mode<synchronous>, transform_indices = @transform_1, window_bounds = array<i64: 320, 64>}, {pipeline_mode = #tpu.pipeline_mode<synchronous>, transform_indices = @transform_2, window_bounds = array<i64: 1, 64>}, {pipeline_mode = #tpu.pipeline_mode<synchronous>, transform_indices = @transform_3, window_bounds = array<i64: 1, 64>}, {pipeline_mode = #tpu.pipeline_mode<synchronous>, transform_indices = @transform_4, window_bounds = array<i64: 1, 1>}, {transform_indices = @transform_5, window_bounds = array<i64: 1, 384>}, {pipeline_mode = #tpu.pipeline_mode<synchronous>, transform_indices = @transform_6, window_bounds = array<i64: 1, 1>}, {pipeline_mode = #tpu.pipeline_mode<synchronous>, transform_indices = @transform_7, window_bounds = array<i64: 1, 1>}, {pipeline_mode = #tpu.pipeline_mode<synchronous>, transform_indices = @transform_8, window_bounds = array<i64: 1, 320>}]} {
    %c0_i32 = arith.constant 0 : i32
    %0 = arith.cmpi eq, %arg0, %c0_i32 : i32
    %1 = arith.extui %0 : i1 to i32
    %c0_i32_0 = arith.constant 0 : i32
    %2 = arith.cmpi ne, %1, %c0_i32_0 : i32
    scf.if %2 {
      %cst_29 = arith.constant 0xFF800000 : f32
      %46 = vector.broadcast %cst_29 : f32 to vector<1x1xf32>
      %c0_30 = arith.constant 0 : index
      %c0_31 = arith.constant 0 : index
      %47 = vector.load %arg7[%c0_30, %c0_31] : memref<1x1xf32, #tpu.memory_space<vmem>>, vector<1x1xf32>
      tpu.vector_store %arg7[%c0_30, %c0_31], %46 {strides = array<i32>} : memref<1x1xf32, #tpu.memory_space<vmem>>, vector<1x1xf32>,
      %cst_32 = arith.constant 0.000000e+00 : f32
      %48 = vector.broadcast %cst_32 : f32 to vector<1x1xf32>
      %c0_33 = arith.constant 0 : index
      %c0_34 = arith.constant 0 : index
      %49 = vector.load %arg8[%c0_33, %c0_34] : memref<1x1xf32, #tpu.memory_space<vmem>>, vector<1x1xf32>
      tpu.vector_store %arg8[%c0_33, %c0_34], %48 {strides = array<i32>} : memref<1x1xf32, #tpu.memory_space<vmem>>, vector<1x1xf32>,
      %cst_35 = arith.constant 0.000000e+00 : f32
      %50 = vector.broadcast %cst_35 : f32 to vector<1x320xf32>
      %c0_36 = arith.constant 0 : index
      %c0_37 = arith.constant 0 : index
      %51 = vector.load %arg9[%c0_36, %c0_37] : memref<1x320xf32, #tpu.memory_space<vmem>>, vector<1x320xf32>
      tpu.vector_store %arg9[%c0_36, %c0_37], %50 {strides = array<i32>} : memref<1x320xf32, #tpu.memory_space<vmem>>, vector<1x320xf32>,
    } else {
    }
    %c0 = arith.constant 0 : index
    %c0_1 = arith.constant 0 : index
    %3 = vector.load %arg1[%c0, %c0_1] : memref<384x320xf32, #tpu.memory_space<vmem>>, vector<384x320xf32>
    %c0_2 = arith.constant 0 : index
    %c0_3 = arith.constant 0 : index
    %4 = vector.load %arg2[%c0_2, %c0_3] : memref<320x64xf32, #tpu.memory_space<vmem>>, vector<320x64xf32>
    %cst = arith.constant dense<0.000000e+00> : vector<384x64xf32>
    %5 = tpu.matmul %3, %4, %cst {dimension_numbers = #tpu.dot_dimension_numbers<[1], [0], [0], [1], [0, 0, 1, 1], [], []>} : vector<384x320xf32>, vector<320x64xf32>, vector<384x64xf32> -> vector<384x64xf32>
    %c0_4 = arith.constant 0 : index
    %c0_5 = arith.constant 0 : index
    %6 = vector.load %arg3[%c0_4, %c0_5] : memref<1x64xf32, #tpu.memory_space<vmem>>, vector<1x64xf32>
    %7 = vector.broadcast %6 : vector<1x64xf32> to vector<384x64xf32>
    %8 = arith.addf %5, %7 : vector<384x64xf32>
    %9 = math.tanh %8 : vector<384x64xf32>
    %c0_6 = arith.constant 0 : index
    %c0_7 = arith.constant 0 : index
    %10 = vector.load %arg4[%c0_6, %c0_7] : memref<1x64xf32, #tpu.memory_space<vmem>>, vector<1x64xf32>
    %cst_8 = arith.constant dense<0.000000e+00> : vector<1x384xf32>
    %11 = tpu.matmul %10, %9, %cst_8 {dimension_numbers = #tpu.dot_dimension_numbers<[1], [1], [0], [0], [0, 0, 1, 0], [], []>} : vector<1x64xf32>, vector<384x64xf32>, vector<1x384xf32> -> vector<1x384xf32>
    %c0_9 = arith.constant 0 : index
    %c0_10 = arith.constant 0 : index
    %12 = vector.load %arg5[%c0_9, %c0_10] : memref<1x1xf32, #tpu.memory_space<vmem>>, vector<1x1xf32>
    %13 = vector.broadcast %12 : vector<1x1xf32> to vector<1x384xf32>
    %14 = arith.addf %11, %13 : vector<1x384xf32>
    %15 = tpu.iota {dimensions = array<i32: 1>} : vector<1x384xi32>
    %c384_i32 = arith.constant 384 : i32
    %16 = arith.muli %arg0, %c384_i32 : i32
    %17 = vector.broadcast %16 : i32 to vector<1x384xi32>
    %18 = arith.addi %15, %17 : vector<1x384xi32>
    %c300_i32 = arith.constant 300 : i32
    %19 = vector.broadcast %c300_i32 : i32 to vector<1x384xi32>
    %20 = arith.cmpi slt, %18, %19 : vector<1x384xi32>
    %cst_11 = arith.constant 0xFF800000 : f32
    %21 = vector.broadcast %cst_11 : f32 to vector<1x384xf32>
    %22 = arith.select %20, %14, %21 : vector<1x384xi1>, vector<1x384xf32>
    %c0_12 = arith.constant 0 : index
    %c0_13 = arith.constant 0 : index
    %23 = vector.load %arg6[%c0_12, %c0_13] : memref<1x384xf32, #tpu.memory_space<vmem>>, vector<1x384xf32>
    tpu.vector_store %arg6[%c0_12, %c0_13], %22 {strides = array<i32>} : memref<1x384xf32, #tpu.memory_space<vmem>>, vector<1x384xf32>,
    %c0_14 = arith.constant 0 : index
    %c0_15 = arith.constant 0 : index
    %24 = vector.load %arg7[%c0_14, %c0_15] : memref<1x1xf32, #tpu.memory_space<vmem>>, vector<1x1xf32>
    %cst_16 = arith.constant dense<0xFF800000> : vector<1xf32>
    %25 = vector.multi_reduction <maximumf>, %22, %cst_16 [1] : vector<1x384xf32> to vector<1xf32>
    %26 = vector.shape_cast %25 : vector<1xf32> to vector<1x1xf32>
    %27 = arith.maximumf %24, %26 : vector<1x1xf32>
    %28 = arith.subf %24, %27 : vector<1x1xf32>
    %29 = math.exp %28 : vector<1x1xf32>
    %30 = vector.broadcast %27 : vector<1x1xf32> to vector<1x384xf32>
    %31 = arith.subf %22, %30 : vector<1x384xf32>
    %32 = math.exp %31 : vector<1x384xf32>
    %c0_17 = arith.constant 0 : index
    %c0_18 = arith.constant 0 : index
    %33 = vector.load %arg8[%c0_17, %c0_18] : memref<1x1xf32, #tpu.memory_space<vmem>>, vector<1x1xf32>
    %34 = arith.mulf %29, %33 : vector<1x1xf32>
    %cst_19 = arith.constant dense<0.000000e+00> : vector<1xf32>
    %35 = vector.multi_reduction <add>, %32, %cst_19 [1] : vector<1x384xf32> to vector<1xf32>
    %36 = vector.shape_cast %35 : vector<1xf32> to vector<1x1xf32>
    %37 = arith.addf %34, %36 : vector<1x1xf32>
    %c0_20 = arith.constant 0 : index
    %c0_21 = arith.constant 0 : index
    %38 = vector.load %arg8[%c0_20, %c0_21] : memref<1x1xf32, #tpu.memory_space<vmem>>, vector<1x1xf32>
    tpu.vector_store %arg8[%c0_20, %c0_21], %37 {strides = array<i32>} : memref<1x1xf32, #tpu.memory_space<vmem>>, vector<1x1xf32>,
    %c0_22 = arith.constant 0 : index
    %c0_23 = arith.constant 0 : index
    %39 = vector.load %arg9[%c0_22, %c0_23] : memref<1x320xf32, #tpu.memory_space<vmem>>, vector<1x320xf32>
    %40 = vector.broadcast %29 : vector<1x1xf32> to vector<1x320xf32>
    %41 = arith.mulf %40, %39 : vector<1x320xf32>
    %cst_24 = arith.constant dense<0.000000e+00> : vector<1x320xf32>
    %42 = tpu.matmul %32, %3, %cst_24 {dimension_numbers = #tpu.dot_dimension_numbers<[1], [0], [0], [1], [0, 0, 1, 1], [], []>} : vector<1x384xf32>, vector<384x320xf32>, vector<1x320xf32> -> vector<1x320xf32>
    %43 = arith.addf %41, %42 : vector<1x320xf32>
    %c0_25 = arith.constant 0 : index
    %c0_26 = arith.constant 0 : index
    %44 = vector.load %arg9[%c0_25, %c0_26] : memref<1x320xf32, #tpu.memory_space<vmem>>, vector<1x320xf32>
    tpu.vector_store %arg9[%c0_25, %c0_26], %43 {strides = array<i32>} : memref<1x320xf32, #tpu.memory_space<vmem>>, vector<1x320xf32>,
    %c0_27 = arith.constant 0 : index
    %c0_28 = arith.constant 0 : index
    %45 = vector.load %arg7[%c0_27, %c0_28] : memref<1x1xf32, #tpu.memory_space<vmem>>, vector<1x1xf32>
    tpu.vector_store %arg7[%c0_27, %c0_28], %27 {strides = array<i32>} : memref<1x1xf32, #tpu.memory_space<vmem>>, vector<1x1xf32>,
    return
  }
  func.func @transform_0(%arg0: i32) -> (i32, i32) {
    %c0_i32 = arith.constant 0 : i32
    %c0_i32_0 = arith.constant 0 : i32
    return %arg0, %c0_i32 : i32, i32
  }
  func.func @transform_1(%arg0: i32) -> (i32, i32) {
    %c0_i32 = arith.constant 0 : i32
    %c0_i32_0 = arith.constant 0 : i32
    %c0_i32_1 = arith.constant 0 : i32
    return %c0_i32, %c0_i32_0 : i32, i32
  }
  func.func @transform_2(%arg0: i32) -> (i32, i32) {
    %c0_i32 = arith.constant 0 : i32
    %c0_i32_0 = arith.constant 0 : i32
    %c0_i32_1 = arith.constant 0 : i32
    return %c0_i32, %c0_i32_0 : i32, i32
  }
  func.func @transform_3(%arg0: i32) -> (i32, i32) {
    %c0_i32 = arith.constant 0 : i32
    %c0_i32_0 = arith.constant 0 : i32
    %c0_i32_1 = arith.constant 0 : i32
    return %c0_i32, %c0_i32_0 : i32, i32
  }
  func.func @transform_4(%arg0: i32) -> (i32, i32) {
    %c0_i32 = arith.constant 0 : i32
    %c0_i32_0 = arith.constant 0 : i32
    %c0_i32_1 = arith.constant 0 : i32
    return %c0_i32, %c0_i32_0 : i32, i32
  }
  func.func @transform_5(%arg0: i32) -> (i32, i32) {
    %c0_i32 = arith.constant 0 : i32
    %c0_i32_0 = arith.constant 0 : i32
    return %c0_i32, %arg0 : i32, i32
  }
  func.func @transform_6(%arg0: i32) -> (i32, i32) {
    %c0_i32 = arith.constant 0 : i32
    %c0_i32_0 = arith.constant 0 : i32
    %c0_i32_1 = arith.constant 0 : i32
    return %c0_i32, %c0_i32_0 : i32, i32
  }
  func.func @transform_7(%arg0: i32) -> (i32, i32) {
    %c0_i32 = arith.constant 0 : i32
    %c0_i32_0 = arith.constant 0 : i32
    %c0_i32_1 = arith.constant 0 : i32
    return %c0_i32, %c0_i32_0 : i32, i32
  }
  func.func @transform_8(%arg0: i32) -> (i32, i32) {
    %c0_i32 = arith.constant 0 : i32
    %c0_i32_0 = arith.constant 0 : i32
    %c0_i32_1 = arith.constant 0 : i32
    return %c0_i32, %c0_i32_0 : i32, i32
  }
}

</mosaic_0001>

<bundles_post_ra>
// kernel: tpu_custom_call.1
= control target key start
LH: loop header
LB: loop body
LE: loop exit
PB: predicated region body
PF: predicated region fallthrough
CT: control target
= control target key end

     0   :  { %s4490_s0 = inlined_call_operand.vmem [shape: f32[384,320], index: 0, kind: input, shape index: {}]   ;;  %s4491_s1 = inlined_call_operand.vmem [shape: f32[320,64], index: 1, kind: input, shape index: {}]   ;;  %s4492_s2 = inlined_call_operand.vmem [shape: f32[1,64], index: 2, kind: input, shape index: {}]   ;;  %s4493_s3 = inlined_call_operand.vmem [shape: f32[1,64], index: 3, kind: input, shape index: {}]   ;;  %s4494_s4 = inlined_call_operand.<no memory space> [shape: f32[1,1], index: 4, kind: input, shape index: {}]   ;;  %s4495_s5 = inlined_call_operand.hbm [shape: f32[1,384], index: 5, kind: output, shape index: {0}]   ;;  %s4496_s6 = inlined_call_operand.hbm [shape: f32[1,1], index: 6, kind: output, shape index: {1}]   ;;  %s4497_s7 = inlined_call_operand.hbm [shape: f32[1,1], index: 7, kind: output, shape index: {2}]   ;;  %s4498_s8 = inlined_call_operand.hbm [shape: f32[1,320], index: 8, kind: output, shape index: {3}]  }
   0x1   :  { %v14_v0 = vstv %s4494_s4 }
   0x2   :  { %15 = vst [vmem:[#allocation2] sm:$0x1] %v14_v0 }
   0x3   :  { %16 = vsyncpa [#allocation4], 0 }
   0x4   :  { %17 = vsyncpa [#allocation6], 0  ;;  %v185_v1 = vld [vmem:[%s4491_s1] sm:$0xff]  ;;  %v186_v2 = vld [vmem:[%s4491_s1 + $0x8] sm:$0xff]  ;;  %v4499_v4 = vmov 0.0|0.0   ;;  %vm232_vm0 = vcmask 523264  }
   0x5   :  { %v187_v3 = vld [vmem:[%s4491_s1 + $0x10] sm:$0xff]  ;;  %2220 = vmatprep.subr.bf16.mxu0 %v4499_v4  ;;  %v2221_v5 = vpack.c.bf16 %v186_v2, %v185_v1  ;;  %v188_v6 = vld [vmem:[%s4491_s1 + $0x18] sm:$0xff]  ;;  %v189_v8 = vld [vmem:[%s4491_s1 + $0x20] sm:$0xff] }
   0x6   :  { %v2224_v7 = vpack.c.bf16 %v188_v6, %v187_v3  ;;  %v190_v9 = vld [vmem:[%s4491_s1 + $0x28] sm:$0xff]  ;;  %v191_v11 = vld [vmem:[%s4491_s1 + $0x30] sm:$0xff]  ;;  %v192_v12 = vld [vmem:[%s4491_s1 + $0x38] sm:$0xff] }
   0x7   :  { %2222 = vmatpush1.bf16.msra.mxu0 %v2221_v5  ;;  %v2227_v10 = vpack.c.bf16 %v190_v9, %v189_v8  ;;  %v217_v13 = vld [vmem:[%s4491_s1 + $0x100] sm:$0xff]  ;;  %v218_v14 = vld [vmem:[%s4491_s1 + $0x108] sm:$0xff]  ;;  %v219_v16 = vld [vmem:[%s4491_s1 + $0x110] sm:$0xff]  ;;  %v2230_v18 = vpack.c.bf16 %v192_v12, %v191_v11 }
   0x8   :  { %2223 = vmatprep.subr.bf16.mxu0 %v4499_v4  ;;  %v2268_v15 = vpack.c.bf16 %v218_v14, %v217_v13  ;;  %v220_v17 = vld [vmem:[%s4491_s1 + $0x118] sm:$0xff]  ;;  %v221_v20 = vld [vmem:[%s4491_s1 + $0x120] sm:$0xff]  ;;  %v222_v21 = vld [vmem:[%s4491_s1 + $0x128] sm:$0xff] }
   0x9   :  { %v2272_v19 = vpack.c.bf16 %v220_v17, %v219_v16  ;;  %v193_v22 = vld [vmem:[%s4491_s1 + $0x40] sm:$0xff]  ;;  %v194_v23 = vld [vmem:[%s4491_s1 + $0x48] sm:$0xff]  ;;  %v223_v24 = vld [vmem:[%s4491_s1 + $0x130] sm:$0xff]  ;;  %v2276_v29 = vpack.c.bf16 %v222_v21, %v221_v20 }
   0xa   :  { %2269 = vmatprep.subr.bf16.mxu1 %v2268_v15  ;;  %v2946_v25 = vld [vmem:[%s4490_s0 + $0x8] sm:$0xff]  ;;  %v2951_v26 = vld [vmem:[%s4490_s0 + $0x20] sm:$0xff]  ;;  %v195_v27 = vld [vmem:[%s4491_s1 + $0x50] sm:$0xff]  ;;  %v2233_v34 = vpack.c.bf16 %v194_v23, %v193_v22 }
   0xb   :  { %2225 = vmatpush1.bf16.msra.mxu0 %v2224_v7  ;;  %2271 = vmatpush3.bf16.msra.mxu1 %v2268_v15  ;;  %v196_v28 = vld [vmem:[%s4491_s1 + $0x58] sm:$0xff]  ;;  %v2968_v32 = vld [vmem:[%s4490_s0 + $0x10] sm:$0xff]  ;;  %v2973_v33 = vld [vmem:[%s4490_s0 + $0x28] sm:$0xff] }
   0xc   :  { %2226 = vmatprep.subr.bf16.mxu0 %v4499_v4  ;;  %2273 = vmatprep.subr.bf16.mxu1 %v2272_v19  ;;  %v224_v30 = vld [vmem:[%s4491_s1 + $0x138] sm:$0xff]  ;;  %4540 = vst [vmem:[#allocation13_spill] sm:$0xff] %v2968_v32  ;;  %4541 = vst [vmem:[#allocation14_spill] sm:$0xff] %v2973_v33  ;;  %v2978_v35 = vld [vmem:[%s4490_s0] sm:$0xff]  ;;  %v2236_v53 = vpack.c.bf16 %v196_v28, %v195_v27 }
   0xd   :  { %441 = vmatprep.mubr.f32.mxu0 %v2946_v25  ;;  %4542 = vst [vmem:[#allocation15_spill] sm:$0xff] %v2978_v35  ;;  %2078 = vmatprep.mubr.msk.f32.mxu1 %vm232_vm0, %v2968_v32  ;;  %v2987_v37 = vld [vmem:[%s4490_s0 + $0x18] sm:$0xff]  ;;  %v3000_v40 = vld [vmem:[%s4490_s0 + $0x40] sm:$0xff]  ;;  %v3010_v42 = vld [vmem:[%s4490_s0 + $0x50] sm:$0xff]  ;;  %v2280_v48 = vpack.c.bf16 %v224_v30, %v223_v24 }
   0xe   :  { %v2992_v38 = vld [vmem:[%s4490_s0 + $0x38] sm:$0xff]  ;;  %4544 = vst [vmem:[#allocation17_spill] sm:$0xff] %v3000_v40  ;;  %4546 = vst [vmem:[#allocation19_spill] sm:$0xff] %v3010_v42  ;;  %v3015_v43 = vld [vmem:[%s4490_s0 + $0x30] sm:$0xff] }
   0xf   :  { %2228 = vmatpush1.bf16.msra.mxu0 %v2227_v10  ;;  %4543 = vst [vmem:[#allocation16_spill] sm:$0xff] %v2992_v38  ;;  %v3005_v41 = vld [vmem:[%s4490_s0 + $0x58] sm:$0xff]  ;;  %2275 = vmatpush3.bf16.msra.mxu1 %v2272_v19  ;;  %4547 = vst [vmem:[#allocation20_spill] sm:$0xff] %v3015_v43  ;;  %v3024_v46 = vld [vmem:[%s4490_s0 + $0x48] sm:$0xff] }
  0x10   :  { %2229 = vmatprep.subr.bf16.mxu0 %v4499_v4  ;;  %4545 = vst [vmem:[#allocation18_spill] sm:$0xff] %v3005_v41  ;;  %4548 = vst [vmem:[#allocation21_spill] sm:$0xff] %v3024_v46  ;;  %v3029_v47 = vld [vmem:[%s4490_s0 + $0x68] sm:$0xff]  ;;  %2277 = vmatprep.subr.bf16.mxu1 %v2276_v29  ;;  %v3036_v50 = vld [vmem:[%s4490_s0 + $0x70] sm:$0xff] }
  0x11   :  { %4549 = vst [vmem:[#allocation22_spill] sm:$0xff] %v3029_v47  ;;  %4550 = vst [vmem:[#allocation23_spill] sm:$0xff] %v3036_v50  ;;  %v3041_v51 = vld [vmem:[%s4490_s0 + $0x88] sm:$0xff]  ;;  %v3046_v52 = vld [vmem:[%s4490_s0 + $0x80] sm:$0xff] }
  0x12   :  { %4551 = vst [vmem:[#allocation24_spill] sm:$0xff] %v3041_v51  ;;  %4552 = vst [vmem:[#allocation25_spill] sm:$0xff] %v3046_v52  ;;  %v197_v54 = vld [vmem:[%s4491_s1 + $0x60] sm:$0xff]  ;;  %v198_v57 = vld [vmem:[%s4491_s1 + $0x68] sm:$0xff] }
  0x13   :  { %2231 = vmatpush1.bf16.msra.mxu0 %v2230_v18  ;;  %v3062_v58 = vld [vmem:[%s4490_s0 + $0xa0] sm:$0xff]  ;;  %v3067_v59 = vld [vmem:[%s4490_s0 + $0xb8] sm:$0xff]  ;;  %2279 = vmatpush3.bf16.msra.mxu1 %v2276_v29  ;;  %v3074_v61 = vld [vmem:[%s4490_s0 + $0xd0] sm:$0xff]  ;;  %v2239_v63 = vpack.c.bf16 %v198_v57, %v197_v54 }
  0x14   :  { %2232 = vmatprep.subr.bf16.mxu0 %v4499_v4  ;;  %4553 = vst [vmem:[#allocation26_spill] sm:$0xff] %v3062_v58  ;;  %4554 = vst [vmem:[#allocation27_spill] sm:$0xff] %v3067_v59  ;;  %2281 = vmatprep.subr.bf16.mxu1 %v2280_v48  ;;  %v3079_v62 = vld [vmem:[%s4490_s0 + $0xe8] sm:$0xff]  ;;  %v199_v0 = vld [vmem:[%s4491_s1 + $0x70] sm:$0xff] }
  0x15   :  { %4555 = vst [vmem:[#allocation28_spill] sm:$0xff] %v3074_v61  ;;  %4556 = vst [vmem:[#allocation29_spill] sm:$0xff] %v3079_v62  ;;  %v200_v2 = vld [vmem:[%s4491_s1 + $0x78] sm:$0xff]  ;;  %v3093_v3 = vld [vmem:[%s4490_s0 + $0x100] sm:$0xff] }
  0x16   :  { %4557 = vst [vmem:[#allocation30_spill] sm:$0xff] %v3093_v3  ;;  %v3098_v5 = vld [vmem:[%s4490_s0 + $0x118] sm:$0xff]  ;;  %v3105_v7 = vld [vmem:[%s4490_s0 + $0x130] sm:$0xff]  ;;  %v3110_v8 = vld [vmem:[%s4490_s0 + $0x148] sm:$0xff]  ;;  %v2242_v9 = vpack.c.bf16 %v200_v2, %v199_v0 }
  0x17   :  { %2234 = vmatpush1.bf16.msra.mxu0 %v2233_v34  ;;  %4558 = vst [vmem:[#allocation31_spill] sm:$0xff] %v3098_v5  ;;  %2283 = vmatpush3.bf16.msra.mxu1 %v2280_v48  ;;  %4559 = vst [vmem:[#allocation32_spill] sm:$0xff] %v3105_v7  ;;  %v201_v10 = vld [vmem:[%s4491_s1 + $0x80] sm:$0xff]  ;;  %v202_v12 = vld [vmem:[%s4491_s1 + $0x88] sm:$0xff] }
  0x18   :  { %2235 = vmatprep.subr.bf16.mxu0 %v4499_v4  ;;  %4560 = vst [vmem:[#allocation33_spill] sm:$0xff] %v3110_v8  ;;  %v3126_v13 = vld [vmem:[%s4490_s0 + $0x160] sm:$0xff]  ;;  %v3131_v14 = vld [vmem:[%s4490_s0 + $0x178] sm:$0xff]  ;;  %v2245_v16 = vpack.c.bf16 %v202_v12, %v201_v10  ;;  %v203_v17 = vld [vmem:[%s4491_s1 + $0x90] sm:$0xff] }
  0x19   :  { %4561 = vst [vmem:[#allocation34_spill] sm:$0xff] %v3126_v13  ;;  %4562 = vst [vmem:[#allocation35_spill] sm:$0xff] %v3131_v14  ;;  %v204_v18 = vld [vmem:[%s4491_s1 + $0x98] sm:$0xff]  ;;  %v205_v20 = vld [vmem:[%s4491_s1 + $0xa0] sm:$0xff] }
  0x1a   :  { %2079 = vmatmul.mubr.msk.f32.vlgmr.msra.gmra.mrb[0].mxu1 %vm232_vm0, %v2973_v33  ;;  %v2248_v19 = vpack.c.bf16 %v204_v18, %v203_v17  ;;  %v206_v21 = vld [vmem:[%s4491_s1 + $0xa8] sm:$0xff]  ;;  %v207_v23 = vld [vmem:[%s4491_s1 + $0xb0] sm:$0xff]  ;;  %v208_v24 = vld [vmem:[%s4491_s1 + $0xb8] sm:$0xff] }
  0x1b   :  { %2237 = vmatpush1.bf16.msra.mxu0 %v2236_v53  ;;  %2081 = vmatprep.mubr.msk.f32.mxu1 %vm232_vm0, %v3000_v40  ;;  %v2251_v22 = vpack.c.bf16 %v206_v21, %v205_v20 }
  0x1c   :  { %2238 = vmatprep.subr.bf16.mxu0 %v4499_v4 }
  0x1e   :  { %2082 = vmatmul.mubr.msk.f32.gmra.mrb[2].mxu1 %vm232_vm0, %v3005_v41 }
  0x1f   :  { %2240 = vmatpush1.bf16.msra.mxu0 %v2239_v63  ;;  %2084 = vmatprep.mubr.msk.f32.mxu1 %vm232_vm0, %v3036_v50 }
  0x20   :  { %2241 = vmatprep.subr.bf16.mxu0 %v4499_v4 }
  0x22   :  { %2085 = vmatmul.mubr.msk.f32.gmra.mrb[4].mxu1 %vm232_vm0, %v3041_v51 }
  0x23   :  { %2243 = vmatpush1.bf16.msra.mxu0 %v2242_v9  ;;  %2087 = vmatprep.mubr.msk.f32.mxu1 %vm232_vm0, %v3062_v58 }
  0x24   :  { %2244 = vmatprep.subr.bf16.mxu0 %v4499_v4 }
  0x26   :  { %2088 = vmatmul.mubr.msk.f32.gmra.mrb[6].mxu1 %vm232_vm0, %v3067_v59 }
  0x27   :  { %2246 = vmatpush1.bf16.msra.mxu0 %v2245_v16 }
  0x28   :  { %2247 = vmatprep.subr.bf16.mxu0 %v4499_v4 }
  0x2b   :  { %2249 = vmatpush1.bf16.msra.mxu0 %v2248_v19 }
  0x2c   :  { %2250 = vmatprep.subr.bf16.mxu0 %v4499_v4 }
  0x2d   :  { %18 = vsyncpa [#allocation9], 0  ;;  %2090 = vmatprep.mubr.msk.f32.mxu1 %vm232_vm0, %v3074_v61  ;;  %v2254_v27 = vpack.c.bf16 %v208_v24, %v207_v23  ;;  %v209_v28 = vld [vmem:[%s4491_s1 + $0xc0] sm:$0xff]  ;;  %v210_v29 = vld [vmem:[%s4491_s1 + $0xc8] sm:$0xff]  ;;  %vm2832_vm2 = vmmov 0   ;;  %vm1382_vm3 = vcmask 1040384  }
  0x2e   :  { %2091 = vmatmul.mubr.msk.f32.gmra.mrb[8].mxu1 %vm232_vm0, %v3079_v62  ;;  %v2257_v30 = vpack.c.bf16 %v210_v29, %v209_v28  ;;  %v211_v34 = vld [vmem:[%s4491_s1 + $0xd0] sm:$0xff]  ;;  %v212_v48 = vld [vmem:[%s4491_s1 + $0xd8] sm:$0xff]  ;;  %v213_v54 = vld [vmem:[%s4491_s1 + $0xe0] sm:$0xff]  ;;  %vm33_vm6 = vcmask 0   ;;  %s2836_s19 = smov [#allocation5]   ;;  %s2837_s20 = smov [#allocation3]  }
  0x2f   :  { %2252 = vmatpush1.bf16.msra.mxu0 %v2251_v22  ;;  %2093 = vmatprep.mubr.msk.f32.mxu1 %vm232_vm0, %v3093_v3  ;;  %v2260_v53 = vpack.c.bf16 %v212_v48, %v211_v34  ;;  %v214_v57 = vld [vmem:[%s4491_s1 + $0xe8] sm:$0xff]  ;;  %v91_v63 = vld [vmem:[%s4490_s0 + $0x190] sm:$0xff]  ;;  %v216_v9 = vld [vmem:[%s4491_s1 + $0xf8] sm:$0xff] }
  0x30   :  { %2253 = vmatprep.subr.bf16.mxu0 %v4499_v4  ;;  %v2263_v0 = vpack.c.bf16 %v214_v57, %v213_v54  ;;  %v215_v2 = vld [vmem:[%s4491_s1 + $0xf0] sm:$0xff]  ;;  %v94_v10 = vld [vmem:[%s4490_s0 + $0x1a8] sm:$0xff]  ;;  %v97_v12 = vld [vmem:[%s4490_s0 + $0x1c0] sm:$0xff] }
  0x31   :  { %v2266_v16 = vpack.c.bf16 %v216_v9, %v215_v2  ;;  %v100_v17 = vld [vmem:[%s4490_s0 + $0x1d8] sm:$0xff]  ;;  %v103_v18 = vld [vmem:[%s4490_s0 + $0x1f0] sm:$0xff]  ;;  %v106_v19 = vld [vmem:[%s4490_s0 + $0x208] sm:$0xff] }
  0x32   :  { %2094 = vmatmul.mubr.msk.f32.gmra.mrb[10].mxu1 %vm232_vm0, %v3098_v5  ;;  %v109_v20 = vld [vmem:[%s4490_s0 + $0x220] sm:$0xff]  ;;  %v112_v21 = vld [vmem:[%s4490_s0 + $0x238] sm:$0xff]  ;;  %v3249_v22 = vld [vmem:[%s4490_s0 + $0x310] sm:$0xff] }
  0x33   :  { %2255 = vmatpush1.bf16.msra.mxu0 %v2254_v27  ;;  %2096 = vmatprep.mubr.msk.f32.mxu1 %vm232_vm0, %v3105_v7  ;;  %4563 = vst [vmem:[#allocation36_spill] sm:$0xff] %v3249_v22  ;;  %v3254_v23 = vld [vmem:[%s4490_s0 + $0x328] sm:$0xff]  ;;  %v115_v24 = vld [vmem:[%s4490_s0 + $0x250] sm:$0xff]  ;;  %v121_v29 = vld [vmem:[%s4490_s0 + $0x280] sm:$0xff] }
  0x34   :  { %2256 = vmatprep.subr.bf16.mxu0 %v4499_v4  ;;  %4564 = vst [vmem:[#allocation37_spill] sm:$0xff] %v3254_v23  ;;  %v118_v28 = vld [vmem:[%s4490_s0 + $0x268] sm:$0xff]  ;;  %v3281_v34 = vld [vmem:[%s4490_s0 + $0x340] sm:$0xff]  ;;  %v3286_v48 = vld [vmem:[%s4490_s0 + $0x358] sm:$0xff] }
  0x35   :  { %4565 = vst [vmem:[#allocation38_spill] sm:$0xff] %v3281_v34  ;;  %4566 = vst [vmem:[#allocation39_spill] sm:$0xff] %v3286_v48  ;;  %v53_v57 = vld [vmem:[%s4490_s0 + $0x60] sm:$0xff]  ;;  %v56_v2 = vld [vmem:[%s4490_s0 + $0x78] sm:$0xff] }
  0x36   :  { %2097 = vmatmul.mubr.msk.f32.gmra.mrb[12].mxu1 %vm232_vm0, %v3110_v8  ;;  %v60_v9 = vld [vmem:[%s4490_s0 + $0x98] sm:$0xff]  ;;  %v179_v15 = vld [vmem:[%s4490_s0 + $0x450] sm:$0xff]  ;;  %v182_v6 = vld [vmem:[%s4490_s0 + $0x468] sm:$0xff] }
  0x37   :  { %2258 = vmatpush1.bf16.msra.mxu0 %v2257_v30  ;;  %2099 = vmatprep.mubr.msk.f32.mxu1 %vm232_vm0, %v3126_v13  ;;  %v124_v30 = vld [vmem:[%s4490_s0 + $0x298] sm:$0xff]  ;;  %vm3857_vm1 = vmpackc.low %vm232_vm0, %vm232_vm0 }
  0x38   :  { %2259 = vmatprep.subr.bf16.mxu0 %v4499_v4  ;;  %v176_v54 = vld [vmem:[%s4490_s0 + $0x438] sm:$0xff] }
  0x3a   :  { %2100 = vmatmul.mubr.msk.f32.gmra.mrb[14].mxu1 %vm232_vm0, %v3131_v14 }
  0x3b   :  { %2261 = vmatpush1.bf16.msra.mxu0 %v2260_v53  ;;  %2102 = vmatprep.mubr.msk.f32.mxu1 %vm232_vm0, %v91_v63  ;;  %v127_v53 = vld [vmem:[%s4490_s0 + $0x2b0] sm:$0xff]  ;;  %v130_v63 = vld [vmem:[%s4490_s0 + $0x2c8] sm:$0xff] }
  0x3c   :  { %2262 = vmatprep.subr.bf16.mxu0 %v4499_v4 }
  0x3e   :  { %2103 = vmatmul.mubr.msk.f32.gmra.mrb[16].mxu1 %vm232_vm0, %v94_v10  ;;  %v136_v10 = vld [vmem:[%s4490_s0 + $0x2f8] sm:$0xff] }
  0x3f   :  { %2264 = vmatpush1.bf16.msra.mxu0 %v2263_v0  ;;  %2105 = vmatprep.mubr.msk.f32.mxu1 %vm232_vm0, %v97_v12  ;;  %v133_v0 = vld [vmem:[%s4490_s0 + $0x2e0] sm:$0xff]  ;;  %v3321_v12 = vld [vmem:[%s4490_s0 + $0x370] sm:$0xff] }
  0x40   :  { %2265 = vmatprep.subr.bf16.mxu0 %v4499_v4  ;;  %4567 = vst [vmem:[#allocation40_spill] sm:$0xff] %v3321_v12 }
  0x42   :  { %2106 = vmatmul.mubr.msk.f32.gmra.mrb[18].mxu1 %vm232_vm0, %v100_v17  ;;  %v92_v17 = vld [vmem:[%s4490_s0 + $0x198] sm:$0xff] }
  0x43   :  { %2267 = vmatpush1.bf16.msra.mxu0 %v2266_v16  ;;  %2108 = vmatprep.mubr.msk.f32.mxu1 %vm232_vm0, %v103_v18  ;;  %v3326_v16 = vld [vmem:[%s4490_s0 + $0x388] sm:$0xff]  ;;  %v59_v18 = vld [vmem:[%s4490_s0 + $0x90] sm:$0xff] }
  0x44   :  { %4568 = vst [vmem:[#allocation41_spill] sm:$0xff] %v3326_v16 }
  0x46   :  { %442 = vmatmul.mubr.f32.vlgmr.msra.gmra.mrb[0].mxu0 %v2978_v35  ;;  %2109 = vmatmul.mubr.msk.f32.gmra.mrb[20].mxu1 %vm232_vm0, %v106_v19  ;;  %v63_v19 = vld [vmem:[%s4490_s0 + $0xb0] sm:$0xff] }
  0x47   :  { %446 = vmatprep.mubr.f32.mxu0 %v2951_v26  ;;  %2111 = vmatprep.mubr.msk.f32.mxu1 %vm232_vm0, %v109_v20  ;;  %v62_v20 = vld [vmem:[%s4490_s0 + $0xa8] sm:$0xff] }
  0x4a   :  { %447 = vmatmul.mubr.f32.gmra.mrb[2].mxu0 %v2987_v37  ;;  %2112 = vmatmul.mubr.msk.f32.gmra.mrb[22].mxu1 %vm232_vm0, %v112_v21  ;;  %v66_v21 = vld [vmem:[%s4490_s0 + $0xc8] sm:$0xff] }
  0x4b   :  { %451 = vmatprep.mubr.f32.mxu0 %v2992_v38  ;;  %2114 = vmatprep.mubr.msk.f32.mxu1 %vm232_vm0, %v115_v24  ;;  %v3352_v24 = vld [vmem:[%s4490_s0 + $0x3a0] sm:$0xff] }
  0x4c   :  { %4569 = vst [vmem:[#allocation42_spill] sm:$0xff] %v3352_v24 }
  0x4e   :  { %452 = vmatmul.mubr.f32.gmra.mrb[4].mxu0 %v3015_v43  ;;  %2115 = vmatmul.mubr.msk.f32.gmra.mrb[24].mxu1 %vm232_vm0, %v118_v28  ;;  %v3357_v28 = vld [vmem:[%s4490_s0 + $0x3b8] sm:$0xff] }
  0x4f   :  { %456 = vmatprep.mubr.f32.mxu0 %v3010_v42  ;;  %2117 = vmatprep.mubr.msk.f32.mxu1 %vm232_vm0, %v121_v29  ;;  %4570 = vst [vmem:[#allocation43_spill] sm:$0xff] %v3357_v28  ;;  %v93_v29 = vld [vmem:[%s4490_s0 + $0x1a0] sm:$0xff] }
  0x52   :  { %457 = vmatmul.mubr.f32.gmra.mrb[6].mxu0 %v3024_v46  ;;  %2118 = vmatmul.mubr.msk.f32.gmra.mrb[26].mxu1 %vm232_vm0, %v124_v30  ;;  %v65_v30 = vld [vmem:[%s4490_s0 + $0xc0] sm:$0xff] }
  0x53   :  { %461 = vmatprep.mubr.f32.mxu0 %v3029_v47  ;;  %2120 = vmatprep.mubr.msk.f32.mxu1 %vm232_vm0, %v127_v53  ;;  %v69_v53 = vld [vmem:[%s4490_s0 + $0xe0] sm:$0xff] }
  0x56   :  { %462 = vmatmul.mubr.f32.gmra.mrb[8].mxu0 %v53_v57  ;;  %2121 = vmatmul.mubr.msk.f32.gmra.mrb[28].mxu1 %vm232_vm0, %v130_v63  ;;  %v68_v57 = vld [vmem:[%s4490_s0 + $0xd8] sm:$0xff] }
  0x57   :  { %466 = vmatprep.mubr.f32.mxu0 %v3046_v52  ;;  %2123 = vmatprep.mubr.msk.f32.mxu1 %vm232_vm0, %v133_v0  ;;  %v72_v63 = vld [vmem:[%s4490_s0 + $0xf8] sm:$0xff]  ;;  %v3384_v0 = vld [vmem:[%s4490_s0 + $0x3d0] sm:$0xff] }
  0x58   :  { %4571 = vst [vmem:[#allocation44_spill] sm:$0xff] %v3384_v0 }
  0x5a   :  { %467 = vmatmul.mubr.f32.gmra.mrb[10].mxu0 %v56_v2  ;;  %2124 = vmatmul.mubr.msk.f32.gmra.mrb[30].mxu1 %vm232_vm0, %v136_v10  ;;  %v3389_v2 = vld [vmem:[%s4490_s0 + $0x3e8] sm:$0xff]  ;;  %v71_v10 = vld [vmem:[%s4490_s0 + $0xf0] sm:$0xff] }
  0x5b   :  { %471 = vmatprep.mubr.f32.mxu0 %v60_v9  ;;  %2126 = vmatprep.mubr.msk.f32.mxu1 %vm232_vm0, %v3249_v22  ;;  %4572 = vst [vmem:[#allocation45_spill] sm:$0xff] %v3389_v2  ;;  %v3464_v9 = vld [vmem:[%s4490_s0 + $0x460] sm:$0xff] }
  0x5c   :  { %4577 = vst [vmem:[#allocation50_spill] sm:$0xff] %v3464_v9 }
  0x5e   :  { %472 = vmatmul.mubr.f32.gmra.mrb[12].mxu0 %v59_v18  ;;  %2127 = vmatmul.mubr.msk.f32.gmra.mrb[32].mxu1 %vm232_vm0, %v3254_v23  ;;  %v75_v18 = vld [vmem:[%s4490_s0 + $0x110] sm:$0xff] }
  0x5f   :  { %476 = vmatprep.mubr.f32.mxu0 %v63_v19  ;;  %2129 = vmatprep.mubr.msk.f32.mxu1 %vm232_vm0, %v3281_v34  ;;  %v3406_v19 = vld [vmem:[%s4490_s0 + $0x400] sm:$0xff] }
  0x60   :  { %4573 = vst [vmem:[#allocation46_spill] sm:$0xff] %v3406_v19 }
  0x62   :  { %477 = vmatmul.mubr.f32.gmra.mrb[14].mxu0 %v62_v20  ;;  %2130 = vmatmul.mubr.msk.f32.gmra.mrb[34].mxu1 %vm232_vm0, %v3286_v48  ;;  %v74_v20 = vld [vmem:[%s4490_s0 + $0x108] sm:$0xff] }
  0x63   :  { %481 = vmatprep.mubr.f32.mxu0 %v66_v21  ;;  %2132 = vmatprep.mubr.msk.f32.mxu1 %vm232_vm0, %v3321_v12  ;;  %v78_v21 = vld [vmem:[%s4490_s0 + $0x128] sm:$0xff] }
  0x66   :  { %482 = vmatmul.mubr.f32.gmra.mrb[16].mxu0 %v65_v30  ;;  %2133 = vmatmul.mubr.msk.f32.gmra.mrb[36].mxu1 %vm232_vm0, %v3326_v16  ;;  %v3421_v30 = vld [vmem:[%s4490_s0 + $0x418] sm:$0xff] }
  0x67   :  { %486 = vmatprep.mubr.f32.mxu0 %v69_v53  ;;  %2135 = vmatprep.mubr.msk.f32.mxu1 %vm232_vm0, %v3352_v24  ;;  %4574 = vst [vmem:[#allocation47_spill] sm:$0xff] %v3421_v30  ;;  %v87_v53 = vld [vmem:[%s4490_s0 + $0x170] sm:$0xff] }
  0x6a   :  { %487 = vmatmul.mubr.f32.gmra.mrb[18].mxu0 %v68_v57  ;;  %2136 = vmatmul.mubr.msk.f32.gmra.mrb[38].mxu1 %vm232_vm0, %v3357_v28  ;;  %v77_v57 = vld [vmem:[%s4490_s0 + $0x120] sm:$0xff] }
  0x6b   :  { %491 = vmatprep.mubr.f32.mxu0 %v72_v63  ;;  %2138 = vmatprep.mubr.msk.f32.mxu1 %vm232_vm0, %v3384_v0  ;;  %v81_v63 = vld [vmem:[%s4490_s0 + $0x140] sm:$0xff] }
  0x6e   :  { %492 = vmatmul.mubr.f32.gmra.mrb[20].mxu0 %v71_v10  ;;  %2139 = vmatmul.mubr.msk.f32.gmra.mrb[40].mxu1 %vm232_vm0, %v3389_v2  ;;  %v3436_v10 = vld [vmem:[%s4490_s0 + $0x430] sm:$0xff] }
  0x6f   :  { %496 = vmatprep.mubr.f32.mxu0 %v75_v18  ;;  %2141 = vmatprep.mubr.msk.f32.mxu1 %vm232_vm0, %v3406_v19  ;;  %4575 = vst [vmem:[#allocation48_spill] sm:$0xff] %v3436_v10  ;;  %v80_v18 = vld [vmem:[%s4490_s0 + $0x138] sm:$0xff] }
  0x72   :  { %497 = vmatmul.mubr.f32.gmra.mrb[22].mxu0 %v74_v20  ;;  %2142 = vmatmul.mubr.msk.f32.gmra.mrb[42].mxu1 %vm232_vm0, %v3421_v30  ;;  %v3446_v20 = vld [vmem:[%s4490_s0 + $0x448] sm:$0xff] }
  0x73   :  { %501 = vmatprep.mubr.f32.mxu0 %v78_v21  ;;  %2144 = vmatprep.mubr.msk.f32.mxu1 %vm232_vm0, %v3436_v10  ;;  %4576 = vst [vmem:[#allocation49_spill] sm:$0xff] %v3446_v20  ;;  %v84_v21 = vld [vmem:[%s4490_s0 + $0x158] sm:$0xff] }
  0x76   :  { %502 = vmatmul.mubr.f32.gmra.mrb[24].mxu0 %v77_v57  ;;  %2145 = vmatmul.mubr.msk.f32.gmra.mrb[44].mxu1 %vm232_vm0, %v3446_v20  ;;  %v89_v57 = vld [vmem:[%s4490_s0 + $0x180] sm:$0xff] }
  0x77   :  { %506 = vmatprep.mubr.f32.mxu0 %v81_v63  ;;  %v83_v63 = vld [vmem:[%s4490_s0 + $0x150] sm:$0xff]  ;;  %2147 = vmatprep.mubr.msk.f32.mxu1 %vm232_vm0, %v3464_v9 }
  0x7a   :  { %507 = vmatmul.mubr.f32.gmra.mrb[26].mxu0 %v80_v18  ;;  %v86_v18 = vld [vmem:[%s4490_s0 + $0x168] sm:$0xff] }
  0x7b   :  { %511 = vmatprep.mubr.f32.mxu0 %v84_v21  ;;  %v3474_v21 = vld [vmem:[%s4490_s0 + $0x478] sm:$0xff] }
  0x7c   :  { %4578 = vst [vmem:[#allocation51_spill] sm:$0xff] %v3474_v21  ;;  %2148 = vmatmul.mubr.msk.f32.gmra.mrb[46].mxu1 %vm232_vm0, %v3474_v21 }
  0x7e   :  { %512 = vmatmul.mubr.f32.gmra.mrb[28].mxu0 %v83_v63  ;;  %v90_v63 = vld [vmem:[%s4490_s0 + $0x188] sm:$0xff] }
  0x7f   :  { %516 = vmatprep.mubr.f32.mxu0 %v87_v53  ;;  %v99_v53 = vld [vmem:[%s4490_s0 + $0x1d0] sm:$0xff] }
  0x82   :  { %517 = vmatmul.mubr.f32.gmra.mrb[30].mxu0 %v86_v18  ;;  %v96_v18 = vld [vmem:[%s4490_s0 + $0x1b8] sm:$0xff] }
  0x83   :  { %521 = vmatprep.mubr.f32.mxu0 %v90_v63  ;;  %v95_v63 = vld [vmem:[%s4490_s0 + $0x1b0] sm:$0xff] }
  0x86   :  { %522 = vmatmul.mubr.f32.gmra.mrb[32].mxu0 %v89_v57  ;;  %v102_v57 = vld [vmem:[%s4490_s0 + $0x1e8] sm:$0xff] }
  0x87   :  { %526 = vmatprep.mubr.f32.mxu0 %v93_v29  ;;  %v98_v29 = vld [vmem:[%s4490_s0 + $0x1c8] sm:$0xff] }
  0x8a   :  { %527 = vmatmul.mubr.f32.gmra.mrb[34].mxu0 %v92_v17  ;;  %v101_v17 = vld [vmem:[%s4490_s0 + $0x1e0] sm:$0xff] }
  0x8b   :  { %531 = vmatprep.mubr.f32.mxu0 %v96_v18  ;;  %v105_v18 = vld [vmem:[%s4490_s0 + $0x200] sm:$0xff] }
  0x8e   :  { %532 = vmatmul.mubr.f32.gmra.mrb[36].mxu0 %v95_v63  ;;  %v108_v63 = vld [vmem:[%s4490_s0 + $0x218] sm:$0xff] }
  0x8f   :  { %536 = vmatprep.mubr.f32.mxu0 %v99_v53  ;;  %v104_v53 = vld [vmem:[%s4490_s0 + $0x1f8] sm:$0xff] }
  0x92   :  { %537 = vmatmul.mubr.f32.gmra.mrb[38].mxu0 %v98_v29  ;;  %v107_v29 = vld [vmem:[%s4490_s0 + $0x210] sm:$0xff] }
  0x93   :  { %541 = vmatprep.mubr.f32.mxu0 %v102_v57  ;;  %v111_v57 = vld [vmem:[%s4490_s0 + $0x230] sm:$0xff] }
  0x96   :  { %542 = vmatmul.mubr.f32.gmra.mrb[40].mxu0 %v101_v17  ;;  %v110_v17 = vld [vmem:[%s4490_s0 + $0x228] sm:$0xff] }
  0x97   :  { %546 = vmatprep.mubr.f32.mxu0 %v105_v18  ;;  %v114_v18 = vld [vmem:[%s4490_s0 + $0x248] sm:$0xff] }
  0x9a   :  { %547 = vmatmul.mubr.f32.gmra.mrb[42].mxu0 %v104_v53  ;;  %v113_v53 = vld [vmem:[%s4490_s0 + $0x240] sm:$0xff] }
  0x9b   :  { %551 = vmatprep.mubr.f32.mxu0 %v108_v63  ;;  %v117_v63 = vld [vmem:[%s4490_s0 + $0x260] sm:$0xff] }
  0x9e   :  { %552 = vmatmul.mubr.f32.gmra.mrb[44].mxu0 %v107_v29  ;;  %v116_v29 = vld [vmem:[%s4490_s0 + $0x258] sm:$0xff] }
  0x9f   :  { %556 = vmatprep.mubr.f32.mxu0 %v111_v57  ;;  %v120_v57 = vld [vmem:[%s4490_s0 + $0x278] sm:$0xff] }
  0xa2   :  { %557 = vmatmul.mubr.f32.gmra.mrb[46].mxu0 %v110_v17  ;;  %v119_v17 = vld [vmem:[%s4490_s0 + $0x270] sm:$0xff] }
  0xa3   :  { %561 = vmatprep.mubr.f32.mxu0 %v114_v18  ;;  %v123_v18 = vld [vmem:[%s4490_s0 + $0x290] sm:$0xff] }
  0xa6   :  { %562 = vmatmul.mubr.f32.gmra.mrb[48].mxu0 %v113_v53  ;;  %v122_v53 = vld [vmem:[%s4490_s0 + $0x288] sm:$0xff] }
  0xa7   :  { %566 = vmatprep.mubr.f32.mxu0 %v117_v63  ;;  %v126_v63 = vld [vmem:[%s4490_s0 + $0x2a8] sm:$0xff] }
  0xaa   :  { %567 = vmatmul.mubr.f32.gmra.mrb[50].mxu0 %v116_v29  ;;  %v125_v29 = vld [vmem:[%s4490_s0 + $0x2a0] sm:$0xff] }
  0xab   :  { %571 = vmatprep.mubr.f32.mxu0 %v120_v57  ;;  %v129_v57 = vld [vmem:[%s4490_s0 + $0x2c0] sm:$0xff] }
  0xae   :  { %572 = vmatmul.mubr.f32.gmra.mrb[52].mxu0 %v119_v17  ;;  %v128_v17 = vld [vmem:[%s4490_s0 + $0x2b8] sm:$0xff] }
  0xaf   :  { %576 = vmatprep.mubr.f32.mxu0 %v123_v18  ;;  %v132_v18 = vld [vmem:[%s4490_s0 + $0x2d8] sm:$0xff] }
  0xb2   :  { %577 = vmatmul.mubr.f32.gmra.mrb[54].mxu0 %v122_v53  ;;  %v131_v53 = vld [vmem:[%s4490_s0 + $0x2d0] sm:$0xff] }
  0xb3   :  { %581 = vmatprep.mubr.f32.mxu0 %v126_v63  ;;  %v135_v63 = vld [vmem:[%s4490_s0 + $0x2f0] sm:$0xff] }
  0xb6   :  { %582 = vmatmul.mubr.f32.gmra.mrb[56].mxu0 %v125_v29  ;;  %v134_v29 = vld [vmem:[%s4490_s0 + $0x2e8] sm:$0xff] }
  0xb7   :  { %586 = vmatprep.mubr.f32.mxu0 %v129_v57  ;;  %v138_v57 = vld [vmem:[%s4490_s0 + $0x308] sm:$0xff] }
  0xba   :  { %587 = vmatmul.mubr.f32.gmra.mrb[58].mxu0 %v128_v17  ;;  %v137_v17 = vld [vmem:[%s4490_s0 + $0x300] sm:$0xff] }
  0xbb   :  { %591 = vmatprep.mubr.f32.mxu0 %v132_v18  ;;  %v141_v18 = vld [vmem:[%s4490_s0 + $0x320] sm:$0xff] }
  0xbe   :  { %592 = vmatmul.mubr.f32.gmra.mrb[60].mxu0 %v131_v53  ;;  %v140_v53 = vld [vmem:[%s4490_s0 + $0x318] sm:$0xff] }
  0xbf   :  { %596 = vmatprep.mubr.f32.mxu0 %v135_v63  ;;  %v144_v63 = vld [vmem:[%s4490_s0 + $0x338] sm:$0xff] }
  0xc2   :  { %597 = vmatmul.mubr.f32.gmra.mrb[62].mxu0 %v134_v29  ;;  %v143_v29 = vld [vmem:[%s4490_s0 + $0x330] sm:$0xff] }
  0xc3   :  { %601 = vmatprep.mubr.f32.mxu0 %v138_v57  ;;  %v147_v57 = vld [vmem:[%s4490_s0 + $0x350] sm:$0xff] }
  0xc6   :  { %602 = vmatmul.mubr.f32.gmra.mrb[64].mxu0 %v137_v17  ;;  %v146_v17 = vld [vmem:[%s4490_s0 + $0x348] sm:$0xff] }
  0xc7   :  { %606 = vmatprep.mubr.f32.mxu0 %v141_v18  ;;  %v150_v18 = vld [vmem:[%s4490_s0 + $0x368] sm:$0xff] }
  0xca   :  { %607 = vmatmul.mubr.f32.gmra.mrb[66].mxu0 %v140_v53  ;;  %v149_v53 = vld [vmem:[%s4490_s0 + $0x360] sm:$0xff] }
  0xcb   :  { %611 = vmatprep.mubr.f32.mxu0 %v144_v63  ;;  %v153_v63 = vld [vmem:[%s4490_s0 + $0x380] sm:$0xff] }
  0xce   :  { %612 = vmatmul.mubr.f32.gmra.mrb[68].mxu0 %v143_v29  ;;  %v152_v29 = vld [vmem:[%s4490_s0 + $0x378] sm:$0xff] }
  0xcf   :  { %616 = vmatprep.mubr.f32.mxu0 %v147_v57  ;;  %v156_v57 = vld [vmem:[%s4490_s0 + $0x398] sm:$0xff] }
  0xd2   :  { %617 = vmatmul.mubr.f32.gmra.mrb[70].mxu0 %v146_v17  ;;  %v155_v17 = vld [vmem:[%s4490_s0 + $0x390] sm:$0xff] }
  0xd3   :  { %621 = vmatprep.mubr.f32.mxu0 %v150_v18  ;;  %v159_v18 = vld [vmem:[%s4490_s0 + $0x3b0] sm:$0xff] }
  0xd6   :  { %622 = vmatmul.mubr.f32.gmra.mrb[72].mxu0 %v149_v53  ;;  %v158_v53 = vld [vmem:[%s4490_s0 + $0x3a8] sm:$0xff] }
  0xd7   :  { %626 = vmatprep.mubr.f32.mxu0 %v153_v63  ;;  %v162_v63 = vld [vmem:[%s4490_s0 + $0x3c8] sm:$0xff] }
  0xda   :  { %627 = vmatmul.mubr.f32.gmra.mrb[74].mxu0 %v152_v29  ;;  %v161_v29 = vld [vmem:[%s4490_s0 + $0x3c0] sm:$0xff] }
  0xdb   :  { %631 = vmatprep.mubr.f32.mxu0 %v156_v57  ;;  %v165_v57 = vld [vmem:[%s4490_s0 + $0x3e0] sm:$0xff] }
  0xde   :  { %632 = vmatmul.mubr.f32.gmra.mrb[76].mxu0 %v155_v17  ;;  %v164_v17 = vld [vmem:[%s4490_s0 + $0x3d8] sm:$0xff] }
  0xdf   :  { %636 = vmatprep.mubr.f32.mxu0 %v159_v18  ;;  %v168_v18 = vld [vmem:[%s4490_s0 + $0x3f8] sm:$0xff] }
  0xe2   :  { %637 = vmatmul.mubr.f32.gmra.mrb[78].mxu0 %v158_v53  ;;  %v167_v53 = vld [vmem:[%s4490_s0 + $0x3f0] sm:$0xff] }
  0xe3   :  { %641 = vmatprep.mubr.f32.mxu0 %v162_v63  ;;  %v171_v63 = vld [vmem:[%s4490_s0 + $0x410] sm:$0xff] }
  0xe6   :  { %642 = vmatmul.mubr.f32.gmra.mrb[80].mxu0 %v161_v29  ;;  %v170_v29 = vld [vmem:[%s4490_s0 + $0x408] sm:$0xff] }
  0xe7   :  { %646 = vmatprep.mubr.f32.mxu0 %v165_v57  ;;  %v174_v57 = vld [vmem:[%s4490_s0 + $0x428] sm:$0xff] }
  0xea   :  { %647 = vmatmul.mubr.f32.gmra.mrb[82].mxu0 %v164_v17  ;;  %v173_v17 = vld [vmem:[%s4490_s0 + $0x420] sm:$0xff] }
  0xeb   :  { %651 = vmatprep.mubr.f32.mxu0 %v168_v18 }
  0xed   :  { %v2080_v18 = vpop.f32.mrb[0].mxu1 }
  0xee   :  { %652 = vmatmul.mubr.f32.gmra.mrb[84].mxu0 %v167_v53  ;;  %v177_v53 = vld [vmem:[%s4490_s0 + $0x440] sm:$0xff] }
  0xef   :  { %656 = vmatprep.mubr.f32.mxu0 %v171_v63  ;;  %v748_v63 = vpop.f32.mrb[1].mxu1 }
  0xf1   :  { %v2083_v27 = vpop.f32.mrb[2].mxu1 }
  0xf2   :  { %657 = vmatmul.mubr.f32.gmra.mrb[86].mxu0 %v170_v29  ;;  %v180_v29 = vld [vmem:[%s4490_s0 + $0x458] sm:$0xff] }
  0xf3   :  { %661 = vmatprep.mubr.f32.mxu0 %v174_v57  ;;  %v758_v57 = vpop.f32.mrb[3].mxu1 }
  0xf5   :  { %v3666_v11 = vpop.f32.mrb[4].mxu1 }
  0xf6   :  { %662 = vmatmul.mubr.f32.gmra.mrb[88].mxu0 %v173_v17  ;;  %v183_v17 = vld [vmem:[%s4490_s0 + $0x470] sm:$0xff] }
  0xf7   :  { %666 = vmatprep.mubr.f32.mxu0 %v177_v53  ;;  %v768_v53 = vpop.f32.mrb[5].mxu1 }
  0xf9   :  { %v3674_v1 = vpop.f32.mrb[6].mxu1 }
  0xfa   :  { %667 = vmatmul.mubr.f32.gmra.mrb[90].mxu0 %v176_v54  ;;  %v3676_v54 = vpop.f32.mrb[7].mxu1 }
  0xfb   :  { %671 = vmatprep.mubr.f32.mxu0 %v180_v29 }
  0xfe   :  { %672 = vmatmul.mubr.f32.gmra.mrb[92].mxu0 %v179_v15 }
  0xff   :  { %676 = vmatprep.mubr.f32.mxu0 %v183_v17 }
 0x101   :  { %v3678_v29 = vpop.f32.mrb[8].mxu1 }
 0x102   :  { %677 = vmatmul.mubr.f32.gmra.mrb[94].mxu0 %v182_v6  ;;  %v3680_v60 = vpop.f32.mrb[9].mxu1  ;;  %v3701_v6 = vld [vmem:[%s4492_s2] ss:$0 sm:$0xff]  ;;  %s1755_s2 = sshll.u32 %s2837_s20, 4  ;;  %s1756_s2 = int_to_ptr.vmem [resolvable:$true] %s1755_s2 }
 0x105   :  { %v3682_v55 = vpop.f32.mrb[10].mxu1 }
 0x106   :  { %v3684_v44 = vpop.f32.mrb[11].mxu1 }
 0x109   :  { %v3686_v36 = vpop.f32.mrb[12].mxu1 }
 0x10a   :  { %v3688_v15 = vpop.f32.mrb[13].mxu1 }
 0x10d   :  { %v3690_v17 = vpop.f32.mrb[14].mxu1 }
 0x10e   :  { %v3692_v56 = vpop.f32.mrb[15].mxu1 }
 0x111   :  { %v3694_v49 = vpop.f32.mrb[16].mxu1 }
 0x112   :  { %v3696_v45 = vpop.f32.mrb[17].mxu1 }
 0x115   :  { %v3703_v39 = vpop.f32.mrb[18].mxu1 }
 0x116   :  { %v3705_v31 = vpop.f32.mrb[19].mxu1 }
 0x119   :  { %v443_v4 = vpop.f32.mrb[0].mxu0  ;;  %v3708_v10 = vpop.f32.mrb[20].mxu1 }
 0x11a   :  { %v444_v9 = vadd.f32 %v3701_v6, %v443_v4  ;;  %v445_v21 = vpop.f32.mrb[1].mxu0  ;;  %v3710_v19 = vpop.f32.mrb[21].mxu1 }
 0x11c   :  { %v749_v20 = vadd.f32 %v748_v63, %v444_v9 }
 0x11d   :  { %v448_v30 = vpop.f32.mrb[2].mxu0  ;;  %v3713_v24 = vpop.f32.mrb[22].mxu1 }
 0x11e   :  { %v449_v0 = vadd.f32 %v3701_v6, %v448_v30  ;;  %v450_v2 = vpop.f32.mrb[3].mxu0  ;;  %v3715_v12 = vpop.f32.mrb[23].mxu1  ;;  %2530 = vtanh.f32 %v749_v20 }
 0x120   :  { %v754_v28 = vadd.f32 %v2080_v18, %v449_v0 }
 0x121   :  { %v453_v16 = vpop.f32.mrb[4].mxu0  ;;  %v3718_v34 = vpop.f32.mrb[24].mxu1 }
 0x122   :  { %2532 = vtanh.f32 %v754_v28  ;;  %v454_v4 = vadd.f32 %v3701_v6, %v453_v16  ;;  %v455_v21 = vpop.f32.mrb[5].mxu0  ;;  %v3720_v63 = vpop.f32.mrb[25].mxu1 }
 0x124   :  { %v759_v9 = vadd.f32 %v758_v57, %v454_v4 }
 0x125   :  { %v458_v48 = vpop.f32.mrb[6].mxu0  ;;  %v3723_v22 = vpop.f32.mrb[26].mxu1 }
 0x126   :  { %v459_v30 = vadd.f32 %v3701_v6, %v458_v48  ;;  %v460_v2 = vpop.f32.mrb[7].mxu0  ;;  %v3725_v18 = vpop.f32.mrb[27].mxu1  ;;  %2534 = vtanh.f32 %v759_v9  ;;  %v3741_v9 = vld [vmem:[%s4493_s3] sm:$0x1] }
 0x127   :  { %1991 = vmatprep.mubr.msk.f32.mxu1 %vm232_vm0, %v3741_v9 }
 0x128   :  { %v764_v0 = vadd.f32 %v2083_v27, %v459_v30  ;;  %v3728_v21 = vpop.eup %2530 }
 0x129   :  { %v463_v20 = vpop.f32.mrb[8].mxu0  ;;  %v3730_v57 = vpop.f32.mrb[28].mxu1 }
 0x12a   :  { %2536 = vtanh.f32 %v764_v0  ;;  %v464_v16 = vadd.f32 %v3701_v6, %v463_v20  ;;  %v465_v28 = vpop.f32.mrb[9].mxu0  ;;  %v3734_v48 = vpop.f32.mrb[29].mxu1 }
 0x12c   :  { %v3732_v4 = vpop.eup %2532  ;;  %v769_v23 = vadd.f32 %v768_v53, %v464_v16 }
 0x12d   :  { %v468_v2 = vpop.f32.mrb[10].mxu0  ;;  %v3746_v20 = vpop.f32.mrb[30].mxu1 }
 0x12e   :  { %v469_v30 = vadd.f32 %v3701_v6, %v468_v2  ;;  %v470_v0 = vpop.f32.mrb[11].mxu0  ;;  %v3749_v16 = vpop.f32.mrb[31].mxu1  ;;  %2538 = vtanh.f32 %v769_v23 }
 0x130   :  { %v774_v53 = vadd.f32 %v3666_v11, %v469_v30  ;;  %v3752_v14 = vpop.eup %2534 }
 0x131   :  { %v473_v28 = vpop.f32.mrb[12].mxu0  ;;  %v3754_v7 = vpop.f32.mrb[32].mxu1 }
 0x132   :  { %2540 = vtanh.f32 %v774_v53  ;;  %v474_v27 = vadd.f32 %v3701_v6, %v473_v28  ;;  %v475_v13 = vpop.f32.mrb[13].mxu0  ;;  %v3759_v8 = vpop.f32.mrb[33].mxu1 }
 0x134   :  { %v3756_v2 = vpop.eup %2536  ;;  %v779_v0 = vadd.f32 %v3676_v54, %v474_v27 }
 0x135   :  { %v478_v3 = vpop.f32.mrb[14].mxu0  ;;  %v3764_v53 = vpop.f32.mrb[34].mxu1 }
 0x136   :  { %v479_v23 = vadd.f32 %v3701_v6, %v478_v3  ;;  %v480_v30 = vpop.f32.mrb[15].mxu0  ;;  %v3767_v28 = vpop.f32.mrb[35].mxu1  ;;  %2542 = vtanh.f32 %v779_v0 }
 0x138   :  { %v784_v13 = vadd.f32 %v3674_v1, %v479_v23  ;;  %v3770_v61 = vpop.eup %2538 }
 0x139   :  { %v483_v5 = vpop.f32.mrb[16].mxu0  ;;  %v3772_v62 = vpop.f32.mrb[36].mxu1 }
 0x13a   :  { %2544 = vtanh.f32 %v784_v13  ;;  %v484_v54 = vadd.f32 %v3701_v6, %v483_v5  ;;  %v485_v27 = vpop.f32.mrb[17].mxu0  ;;  %v3777_v30 = vpop.f32.mrb[37].mxu1 }
 0x13c   :  { %v3774_v11 = vpop.eup %2540  ;;  %v789_v3 = vadd.f32 %v3680_v60, %v484_v54 }
 0x13d   :  { %v488_v58 = vpop.f32.mrb[18].mxu0  ;;  %v3782_v13 = vpop.f32.mrb[38].mxu1 }
 0x13e   :  { %v489_v0 = vadd.f32 %v3701_v6, %v488_v58  ;;  %v490_v23 = vpop.f32.mrb[19].mxu0  ;;  %v3785_v27 = vpop.f32.mrb[39].mxu1  ;;  %2546 = vtanh.f32 %v789_v3 }
 0x140   :  { %v794_v5 = vadd.f32 %v3678_v29, %v489_v0  ;;  %v3788_v50 = vpop.eup %2542 }
 0x141   :  { %v493_v59 = vpop.f32.mrb[20].mxu0  ;;  %v3790_v51 = vpop.f32.mrb[40].mxu1 }
 0x142   :  { %2548 = vtanh.f32 %v794_v5  ;;  %v494_v60 = vadd.f32 %v3701_v6, %v493_v59  ;;  %v495_v54 = vpop.f32.mrb[21].mxu0  ;;  %v3795_v23 = vpop.f32.mrb[41].mxu1 }
 0x144   :  { %v3792_v1 = vpop.eup %2544  ;;  %v799_v58 = vadd.f32 %v3684_v44, %v494_v60 }
 0x145   :  { %v498_v40 = vpop.f32.mrb[22].mxu0  ;;  %v3800_v5 = vpop.f32.mrb[42].mxu1 }
 0x146   :  { %v499_v3 = vadd.f32 %v3701_v6, %v498_v40  ;;  %v500_v0 = vpop.f32.mrb[23].mxu0  ;;  %v3803_v54 = vpop.f32.mrb[43].mxu1  ;;  %2550 = vtanh.f32 %v799_v58 }
 0x148   :  { %v804_v59 = vadd.f32 %v3682_v55, %v499_v3  ;;  %v3806_v32 = vpop.eup %2546 }
 0x149   :  { %v503_v41 = vpop.f32.mrb[24].mxu0  ;;  %v3808_v33 = vpop.f32.mrb[44].mxu1 }
 0x14a   :  { %2552 = vtanh.f32 %v804_v59  ;;  %v504_v44 = vadd.f32 %v3701_v6, %v503_v41  ;;  %v505_v60 = vpop.f32.mrb[25].mxu0  ;;  %v3813_v0 = vpop.f32.mrb[45].mxu1 }
 0x14c   :  { %v3810_v29 = vpop.eup %2548  ;;  %v809_v40 = vadd.f32 %v3688_v15, %v504_v44 }
 0x14d   :  { %v508_v47 = vpop.f32.mrb[26].mxu0 }
 0x14e   :  { %v509_v58 = vadd.f32 %v3701_v6, %v508_v47  ;;  %v510_v3 = vpop.f32.mrb[27].mxu0  ;;  %2554 = vtanh.f32 %v809_v40 }
 0x14f   :  { %v3822_v15 = vpop.f32.mrb[46].mxu1 }
 0x150   :  { %v814_v41 = vadd.f32 %v3686_v36, %v509_v58  ;;  %v3820_v43 = vpop.eup %2550  ;;  %v3827_v55 = vpop.f32.mrb[47].mxu1 }
 0x151   :  { %v513_v59 = vpop.f32.mrb[28].mxu0 }
 0x152   :  { %2556 = vtanh.f32 %v814_v41  ;;  %v514_v60 = vadd.f32 %v3701_v6, %v513_v59  ;;  %v515_v52 = vpop.f32.mrb[29].mxu0 }
 0x154   :  { %v3824_v44 = vpop.eup %2552  ;;  %v819_v46 = vadd.f32 %v3692_v56, %v514_v60 }
 0x155   :  { %v518_v47 = vpop.f32.mrb[30].mxu0 }
 0x156   :  { %v519_v40 = vadd.f32 %v3701_v6, %v518_v47  ;;  %v520_v58 = vpop.f32.mrb[31].mxu0  ;;  %2558 = vtanh.f32 %v819_v46 }
 0x158   :  { %v824_v3 = vadd.f32 %v3690_v17, %v519_v40  ;;  %v3834_v38 = vpop.eup %2554 }
 0x159   :  { %v523_v52 = vpop.f32.mrb[32].mxu0 }
 0x15a   :  { %2560 = vtanh.f32 %v824_v3  ;;  %v524_v41 = vadd.f32 %v3701_v6, %v523_v52  ;;  %v525_v59 = vpop.f32.mrb[33].mxu0 }
 0x15c   :  { %v3836_v56 = vpop.eup %2556  ;;  %v829_v60 = vadd.f32 %v3696_v45, %v524_v41 }
 0x15d   :  { %v528_v42 = vpop.f32.mrb[34].mxu0 }
 0x15e   :  { %v529_v47 = vadd.f32 %v3701_v6, %v528_v42  ;;  %v530_v58 = vpop.f32.mrb[35].mxu0  ;;  %2562 = vtanh.f32 %v829_v60 }
 0x160   :  { %v834_v46 = vadd.f32 %v3694_v49, %v529_v47  ;;  %v3844_v52 = vpop.eup %2558 }
 0x161   :  { %v533_v17 = vpop.f32.mrb[36].mxu0 }
 0x162   :  { %2564 = vtanh.f32 %v834_v46  ;;  %v534_v40 = vadd.f32 %v3701_v6, %v533_v17  ;;  %v535_v3 = vpop.f32.mrb[37].mxu0 }
 0x164   :  { %v3846_v59 = vpop.eup %2560  ;;  %v839_v45 = vadd.f32 %v3705_v31, %v534_v40  ;;  %v2634_v31 = vld [vmem:[%s4490_s0 + $0x60] sm:$0xff] }
 0x165   :  { %v538_v41 = vpop.f32.mrb[38].mxu0  ;;  %v2329_v36 = vpack.c.bf16 %v3846_v59, %v3844_v52  ;;  %v2833_v59 = vmov 0.0  }
 0x166   :  { %v539_v42 = vadd.f32 %v3701_v6, %v538_v41  ;;  %v540_v58 = vpop.f32.mrb[39].mxu0  ;;  %2566 = vtanh.f32 %v839_v45  ;;  %35 = vst.msk [vmem:[#allocation7] sm:$0x1] %vm33_vm6, %v2833_v59 }
 0x168   :  { %v844_v49 = vadd.f32 %v3703_v39, %v539_v42  ;;  %v2563_v17 = vpop.eup %2562  ;;  %v1036_v42 = vld [vmem:[#allocation2] sm:$0x1] }
 0x169   :  { %v543_v60 = vpop.f32.mrb[40].mxu0 }
 0x16a   :  { %2568 = vtanh.f32 %v844_v49  ;;  %v544_v47 = vadd.f32 %v3701_v6, %v543_v60  ;;  %v545_v46 = vpop.f32.mrb[41].mxu0  ;;  %v2831_v49 = vmov 0  }
 0x16b   :  { %2528 = vset.pattern.permute.xlu0 %v2831_v49  ;;  %2529 = vset.pattern.permute.xlu1 %v2831_v49 }
 0x16c   :  { %v2565_v3 = vpop.eup %2564  ;;  %v849_v35 = vadd.f32 %v3710_v19, %v544_v47  ;;  %v4581_v19 = vpack.c.bf16 %v3732_v4, %v3728_v21  ;;  %1039 = vperm.xlu0 %2528, %v1036_v42  }
 0x16d   :  { %v548_v40 = vpop.f32.mrb[42].mxu0  ;;  %v2284_v41 = vpack.c.bf16 %v2565_v3, %v2563_v17 }
 0x16e   :  { %v549_v39 = vadd.f32 %v3701_v6, %v548_v40  ;;  %v550_v45 = vpop.f32.mrb[43].mxu0  ;;  %2570 = vtanh.f32 %v849_v35 }
 0x16f   :  { %2286 = vmatprep.subr.msk.bf16.mxu1 %vm3857_vm1, %v2284_v41 }
 0x170   :  { %v854_v58 = vadd.f32 %v3708_v10, %v549_v39  ;;  %2289 = vmatpush3.bf16.xpose.msk.msra.mxu1 %vm3857_vm1, %v4581_v19  ;;  %v2567_v17 = vpop.eup %2566  ;;  %v4582_v39 = vpack.c.bf16 %v3756_v2, %v3752_v14  ;;  %v4583_v2 = vpack.c.bf16 %v3774_v11, %v3770_v61  ;;  %v4584_v11 = vpack.c.bf16 %v3792_v1, %v3788_v50 }
 0x171   :  { %v553_v60 = vpop.f32.mrb[44].mxu0  ;;  %v4585_v1 = vpack.c.bf16 %v3810_v29, %v3806_v32  ;;  %v4586_v29 = vpack.c.bf16 %v3824_v44, %v3820_v43  ;;  %v4587_v44 = vpack.c.bf16 %v3836_v56, %v3834_v38 }
 0x172   :  { %2572 = vtanh.f32 %v854_v58  ;;  %v554_v47 = vadd.f32 %v3701_v6, %v553_v60  ;;  %v555_v46 = vpop.f32.mrb[45].mxu0 }
 0x174   :  { %v2569_v3 = vpop.eup %2568  ;;  %v859_v10 = vadd.f32 %v3715_v12, %v554_v47 }
 0x175   :  { %v558_v40 = vpop.f32.mrb[46].mxu0  ;;  %v2290_v41 = vpack.c.bf16 %v2569_v3, %v2567_v17 }
 0x176   :  { %v559_v21 = vadd.f32 %v3701_v6, %v558_v40  ;;  %v560_v4 = vpop.f32.mrb[47].mxu0  ;;  %2574 = vtanh.f32 %v859_v10 }
 0x177   :  { %2292 = vmatprep.subr.msk.bf16.mxu1 %vm3857_vm1, %v2290_v41 }
 0x178   :  { %v864_v35 = vadd.f32 %v3713_v24, %v559_v21  ;;  %2295 = vmatpush3.bf16.xpose.msk.msra.mxu1 %vm3857_vm1, %v4582_v39  ;;  %v2571_v58 = vpop.eup %2570 }
 0x179   :  { %v563_v45 = vpop.f32.mrb[48].mxu0 }
 0x17a   :  { %2576 = vtanh.f32 %v864_v35  ;;  %v564_v12 = vadd.f32 %v3701_v6, %v563_v45  ;;  %v565_v42 = vpop.f32.mrb[49].mxu0 }
 0x17c   :  { %v2573_v19 = vpop.eup %2572  ;;  %v869_v49 = vadd.f32 %v3720_v63, %v564_v12 }
 0x17d   :  { %v568_v60 = vpop.f32.mrb[50].mxu0  ;;  %v2296_v47 = vpack.c.bf16 %v2573_v19, %v2571_v58 }
 0x17e   :  { %v569_v24 = vadd.f32 %v3701_v6, %v568_v60  ;;  %v570_v46 = vpop.f32.mrb[51].mxu0  ;;  %2578 = vtanh.f32 %v869_v49 }
 0x17f   :  { %2298 = vmatprep.subr.msk.bf16.mxu1 %vm3857_vm1, %v2296_v47 }
 0x180   :  { %v874_v14 = vadd.f32 %v3718_v34, %v569_v24  ;;  %2301 = vmatpush3.bf16.xpose.msk.msra.mxu1 %vm3857_vm1, %v4583_v2  ;;  %v2575_v10 = vpop.eup %2574 }
 0x181   :  { %v573_v17 = vpop.f32.mrb[52].mxu0 }
 0x182   :  { %2580 = vtanh.f32 %v874_v14  ;;  %v574_v63 = vadd.f32 %v3701_v6, %v573_v17  ;;  %v575_v3 = vpop.f32.mrb[53].mxu0 }
 0x184   :  { %v2577_v40 = vpop.eup %2576  ;;  %v879_v41 = vadd.f32 %v3725_v18, %v574_v63 }
 0x185   :  { %v578_v21 = vpop.f32.mrb[54].mxu0  ;;  %v2302_v4 = vpack.c.bf16 %v2577_v40, %v2575_v10 }
 0x186   :  { %v579_v34 = vadd.f32 %v3701_v6, %v578_v21  ;;  %v580_v35 = vpop.f32.mrb[55].mxu0  ;;  %2582 = vtanh.f32 %v879_v41 }
 0x187   :  { %2304 = vmatprep.subr.msk.bf16.mxu1 %vm3857_vm1, %v2302_v4 }
 0x188   :  { %v884_v61 = vadd.f32 %v3723_v22, %v579_v34  ;;  %2307 = vmatpush3.bf16.xpose.msk.msra.mxu1 %vm3857_vm1, %v4584_v11  ;;  %v2579_v12 = vpop.eup %2578 }
 0x189   :  { %v583_v39 = vpop.f32.mrb[56].mxu0 }
 0x18a   :  { %2584 = vtanh.f32 %v884_v61  ;;  %v584_v18 = vadd.f32 %v3701_v6, %v583_v39  ;;  %v585_v45 = vpop.f32.mrb[57].mxu0 }
 0x18c   :  { %v2581_v42 = vpop.eup %2580  ;;  %v889_v58 = vadd.f32 %v3734_v48, %v584_v18 }
 0x18d   :  { %v588_v19 = vpop.f32.mrb[58].mxu0  ;;  %v2308_v49 = vpack.c.bf16 %v2581_v42, %v2579_v12 }
 0x18e   :  { %v589_v22 = vadd.f32 %v3701_v6, %v588_v19  ;;  %v590_v60 = vpop.f32.mrb[59].mxu0  ;;  %2586 = vtanh.f32 %v889_v58 }
 0x18f   :  { %2310 = vmatprep.subr.msk.bf16.mxu1 %vm3857_vm1, %v2308_v49  ;;  %v4588_v49 = vmov 0.0|0.0  }
 0x190   :  { %v894_v50 = vadd.f32 %v3730_v57, %v589_v22  ;;  %2313 = vmatpush3.bf16.xpose.msk.msra.mxu1 %vm3857_vm1, %v4585_v1  ;;  %v2583_v46 = vpop.eup %2582 }
 0x191   :  { %v593_v47 = vpop.f32.mrb[60].mxu0 }
 0x192   :  { %2588 = vtanh.f32 %v894_v50  ;;  %v594_v48 = vadd.f32 %v3701_v6, %v593_v47  ;;  %v595_v24 = vpop.f32.mrb[61].mxu0 }
 0x194   :  { %v2585_v14 = vpop.eup %2584  ;;  %v899_v2 = vadd.f32 %v3749_v16, %v594_v48 }
 0x195   :  { %v598_v17 = vpop.f32.mrb[62].mxu0  ;;  %v2314_v63 = vpack.c.bf16 %v2585_v14, %v2583_v46 }
 0x196   :  { %v599_v57 = vadd.f32 %v3701_v6, %v598_v17  ;;  %v600_v3 = vpop.f32.mrb[63].mxu0  ;;  %2590 = vtanh.f32 %v899_v2 }
 0x197   :  { %2316 = vmatprep.subr.msk.bf16.mxu1 %vm3857_vm1, %v2314_v63 }
 0x198   :  { %v904_v32 = vadd.f32 %v3746_v20, %v599_v57  ;;  %2319 = vmatpush3.bf16.xpose.msk.msra.mxu1 %vm3857_vm1, %v4586_v29  ;;  %v2587_v41 = vpop.eup %2586 }
 0x199   :  { %v603_v10 = vpop.f32.mrb[64].mxu0 }
 0x19a   :  { %2592 = vtanh.f32 %v904_v32  ;;  %v604_v16 = vadd.f32 %v3701_v6, %v603_v10  ;;  %v605_v40 = vpop.f32.mrb[65].mxu0 }
 0x19c   :  { %v2589_v21 = vpop.eup %2588  ;;  %v909_v4 = vadd.f32 %v3759_v8, %v604_v16 }
 0x19d   :  { %v608_v34 = vpop.f32.mrb[66].mxu0  ;;  %v2320_v35 = vpack.c.bf16 %v2589_v21, %v2587_v41 }
 0x19e   :  { %v609_v20 = vadd.f32 %v3701_v6, %v608_v34  ;;  %v610_v61 = vpop.f32.mrb[67].mxu0  ;;  %2594 = vtanh.f32 %v909_v4 }
 0x19f   :  { %2322 = vmatprep.subr.msk.bf16.mxu1 %vm3857_vm1, %v2320_v35 }
 0x1a0   :  { %v914_v43 = vadd.f32 %v3754_v7, %v609_v20  ;;  %2325 = vmatpush3.bf16.xpose.msk.msra.mxu1 %vm3857_vm1, %v4587_v44  ;;  %v2591_v18 = vpop.eup %2590 }
 0x1a1   :  { %v613_v11 = vpop.f32.mrb[68].mxu0 }
 0x1a2   :  { %2596 = vtanh.f32 %v914_v43  ;;  %v614_v8 = vadd.f32 %v3701_v6, %v613_v11  ;;  %v615_v39 = vpop.f32.mrb[69].mxu0 }
 0x1a4   :  { %v2593_v45 = vpop.eup %2592  ;;  %v919_v12 = vadd.f32 %v3767_v28, %v614_v8 }
 0x1a5   :  { %v618_v42 = vpop.f32.mrb[70].mxu0  ;;  %v2326_v58 = vpack.c.bf16 %v2593_v45, %v2591_v18 }
 0x1a6   :  { %v619_v7 = vadd.f32 %v3701_v6, %v618_v42  ;;  %v620_v19 = vpop.f32.mrb[71].mxu0  ;;  %2598 = vtanh.f32 %v919_v12 }
 0x1a7   :  { %2328 = vmatprep.subr.msk.bf16.mxu1 %vm3857_vm1, %v2326_v58 }
 0x1a8   :  { %v924_v38 = vadd.f32 %v3764_v53, %v619_v7  ;;  %2331 = vmatpush3.bf16.xpose.msk.msra.mxu1 %vm3857_vm1, %v2329_v36  ;;  %v2595_v60 = vpop.eup %2594 }
 0x1a9   :  { %v623_v56 = vpop.f32.mrb[72].mxu0  ;;  %2332 = vmatprep.subr.bf16.mxu1 %v4588_v49 }
 0x1aa   :  { %2600 = vtanh.f32 %v924_v38  ;;  %v624_v28 = vadd.f32 %v3701_v6, %v623_v56  ;;  %v625_v22 = vpop.f32.mrb[73].mxu0 }
 0x1ac   :  { %v2597_v50 = vpop.eup %2596  ;;  %v929_v1 = vadd.f32 %v3777_v30, %v624_v28 }
 0x1ad   :  { %v628_v47 = vpop.f32.mrb[74].mxu0  ;;  %v2333_v53 = vpack.c.bf16 %v2597_v50, %v2595_v60 }
 0x1ae   :  { %v629_v48 = vadd.f32 %v3701_v6, %v628_v47  ;;  %v630_v52 = vpop.f32.mrb[75].mxu0  ;;  %2602 = vtanh.f32 %v929_v1 }
 0x1af   :  { %1992 = vmatmul.mubr.msk.f32.vlgmr.msra.gmra.mrb[48].mxu1 %vm232_vm0, %v3741_v9 }
 0x1b0   :  { %v934_v36 = vadd.f32 %v3772_v62, %v629_v48  ;;  %2335 = vmatpush3.bf16.xpose.msk.msra.mxu1 %vm3857_vm1, %v2333_v53  ;;  %2182 = vmatprep.mubr.msk.f32.mxu1 %vm2832_vm2, %v2833_v59  ;;  %v2599_v14 = vpop.eup %2598 }
 0x1b1   :  { %v633_v30 = vpop.f32.mrb[76].mxu0  ;;  %2336 = vmatprep.subr.bf16.mxu1 %v4588_v49 }
 0x1b2   :  { %2604 = vtanh.f32 %v934_v36  ;;  %v634_v24 = vadd.f32 %v3701_v6, %v633_v30  ;;  %v635_v46 = vpop.f32.mrb[77].mxu0 }
 0x1b4   :  { %v2601_v2 = vpop.eup %2600  ;;  %v939_v62 = vadd.f32 %v3785_v27, %v634_v24 }
 0x1b5   :  { %v638_v17 = vpop.f32.mrb[78].mxu0  ;;  %v2337_v63 = vpack.c.bf16 %v2601_v2, %v2599_v14 }
 0x1b6   :  { %v639_v57 = vadd.f32 %v3701_v6, %v638_v17  ;;  %v640_v3 = vpop.f32.mrb[79].mxu0  ;;  %2606 = vtanh.f32 %v939_v62  ;;  %v4590_v62 = vld [vmem:[#allocation15_spill] sm:$0xff] }
 0x1b7   :  { %v4591_v17 = vpack.c.bf16 %v2987_v37, %v4590_v62  ;;  %v2636_v37 = vld [vmem:[%s4490_s0 + $0x98] sm:$0xff] }
 0x1b8   :  { %v944_v32 = vadd.f32 %v3782_v13, %v639_v57  ;;  %2339 = vmatpush3.bf16.xpose.msk.msra.mxu1 %vm3857_vm1, %v2337_v63  ;;  %v2603_v40 = vpop.eup %2602  ;;  %v4592_v63 = vld [vmem:[#allocation19_spill] sm:$0xff]  ;;  %v4593_v57 = vld [vmem:[#allocation16_spill] sm:$0xff] }
 0x1b9   :  { %v643_v29 = vpop.f32.mrb[80].mxu0  ;;  %2340 = vmatprep.subr.bf16.mxu1 %v4588_v49  ;;  %v4594_v3 = vpack.c.bf16 %v4592_v63, %v4593_v57  ;;  %v2668_v62 = vld [vmem:[%s4490_s0 + $0x218] sm:$0xff]  ;;  %v2670_v57 = vld [vmem:[%s4490_s0 + $0x210] sm:$0xff] }
 0x1ba   :  { %2608 = vtanh.f32 %v944_v32  ;;  %v644_v10 = vadd.f32 %v3701_v6, %v643_v29  ;;  %v645_v16 = vpop.f32.mrb[81].mxu0  ;;  %v4595_v32 = vld [vmem:[#allocation21_spill] sm:$0xff]  ;;  %v4596_v29 = vld [vmem:[#allocation20_spill] sm:$0xff] }
 0x1bc   :  { %v2605_v27 = vpop.eup %2604  ;;  %v949_v41 = vadd.f32 %v3795_v23, %v644_v10  ;;  %v2637_v10 = vld [vmem:[%s4490_s0 + $0xb0] sm:$0xff] }
 0x1bd   :  { %v648_v21 = vpop.f32.mrb[82].mxu0  ;;  %v2341_v4 = vpack.c.bf16 %v2605_v27, %v2603_v40  ;;  %v2376_v16 = vpack.c.bf16 %v2637_v10, %v2636_v37  ;;  %v4598_v40 = vld [vmem:[#allocation25_spill] sm:$0xff]  ;;  %v4599_v27 = vld [vmem:[#allocation22_spill] sm:$0xff] }
 0x1be   :  { %v649_v34 = vadd.f32 %v3701_v6, %v648_v21  ;;  %v650_v13 = vpop.f32.mrb[83].mxu0  ;;  %2610 = vtanh.f32 %v949_v41  ;;  %v4600_v41 = vpack.c.bf16 %v4598_v40, %v4599_v27  ;;  %v2638_v21 = vld [vmem:[%s4490_s0 + $0x90] sm:$0xff]  ;;  %v2676_v10 = vld [vmem:[%s4490_s0 + $0x278] sm:$0xff] }
 0x1bf   :  { %v2640_v13 = vld [vmem:[%s4490_s0 + $0xc8] sm:$0xff]  ;;  %v2678_v27 = vld [vmem:[%s4490_s0 + $0x270] sm:$0xff] }
 0x1c0   :  { %v954_v35 = vadd.f32 %v3790_v51, %v649_v34  ;;  %2343 = vmatpush3.bf16.xpose.msk.msra.mxu1 %vm3857_vm1, %v2341_v4  ;;  %v2607_v44 = vpop.eup %2606  ;;  %v2639_v4 = vld [vmem:[%s4490_s0 + $0xa8] sm:$0xff] }
 0x1c1   :  { %v653_v20 = vpop.f32.mrb[84].mxu0  ;;  %2344 = vmatprep.subr.bf16.mxu1 %v4588_v49  ;;  %v2378_v34 = vpack.c.bf16 %v2639_v4, %v2638_v21  ;;  %v2680_v4 = vld [vmem:[%s4490_s0 + $0x2a8] sm:$0xff] }
 0x1c2   :  { %2612 = vtanh.f32 %v954_v35  ;;  %v654_v61 = vadd.f32 %v3701_v6, %v653_v20  ;;  %v655_v43 = vpop.f32.mrb[85].mxu0  ;;  %v2641_v35 = vld [vmem:[%s4490_s0 + $0xe0] sm:$0xff] }
 0x1c3   :  { %v2380_v20 = vpack.c.bf16 %v2641_v35, %v2640_v13  ;;  %v2643_v43 = vld [vmem:[%s4490_s0 + $0xd8] sm:$0xff]  ;;  %v2682_v35 = vld [vmem:[%s4490_s0 + $0x2a0] sm:$0xff] }
 0x1c4   :  { %v2609_v23 = vpop.eup %2608  ;;  %v959_v11 = vadd.f32 %v3803_v54, %v654_v61  ;;  %v2642_v61 = vld [vmem:[%s4490_s0 + $0xc0] sm:$0xff] }
 0x1c5   :  { %v658_v8 = vpop.f32.mrb[86].mxu0  ;;  %v2345_v39 = vpack.c.bf16 %v2609_v23, %v2607_v44  ;;  %v2382_v44 = vpack.c.bf16 %v2643_v43, %v2642_v61  ;;  %v2644_v23 = vld [vmem:[%s4490_s0 + $0xf8] sm:$0xff] }
 0x1c6   :  { %v659_v18 = vadd.f32 %v3701_v6, %v658_v8  ;;  %v660_v51 = vpop.f32.mrb[87].mxu0  ;;  %2614 = vtanh.f32 %v959_v11  ;;  %v2645_v11 = vld [vmem:[%s4490_s0 + $0x110] sm:$0xff]  ;;  %v2684_v43 = vld [vmem:[%s4490_s0 + $0x2d8] sm:$0xff] }
 0x1c7   :  { %v2384_v8 = vpack.c.bf16 %v2645_v11, %v2644_v23  ;;  %v2686_v11 = vld [vmem:[%s4490_s0 + $0x2d0] sm:$0xff] }
 0x1c8   :  { %v964_v45 = vadd.f32 %v3800_v5, %v659_v18  ;;  %2347 = vmatpush3.bf16.xpose.msk.msra.mxu1 %vm3857_vm1, %v2345_v39  ;;  %v2611_v7 = vpop.eup %2610  ;;  %v2646_v39 = vld [vmem:[%s4490_s0 + $0xf0] sm:$0xff]  ;;  %v2647_v18 = vld [vmem:[%s4490_s0 + $0x108] sm:$0xff] }
 0x1c9   :  { %v663_v12 = vpop.f32.mrb[88].mxu0  ;;  %2348 = vmatprep.subr.bf16.mxu1 %v4588_v49  ;;  %v2386_v51 = vpack.c.bf16 %v2647_v18, %v2646_v39  ;;  %v2688_v18 = vld [vmem:[%s4490_s0 + $0x308] sm:$0xff] }
 0x1ca   :  { %2616 = vtanh.f32 %v964_v45  ;;  %v664_v42 = vadd.f32 %v3701_v6, %v663_v12  ;;  %v665_v58 = vpop.f32.mrb[89].mxu0  ;;  %v2648_v45 = vld [vmem:[%s4490_s0 + $0x128] sm:$0xff]  ;;  %v2649_v12 = vld [vmem:[%s4490_s0 + $0x140] sm:$0xff] }
 0x1cb   :  { %v2650_v58 = vld [vmem:[%s4490_s0 + $0x120] sm:$0xff] }
 0x1cc   :  { %v2613_v54 = vpop.eup %2612  ;;  %v969_v19 = vadd.f32 %v3813_v0, %v664_v42  ;;  %v2388_v42 = vpack.c.bf16 %v2649_v12, %v2648_v45  ;;  %v2690_v12 = vld [vmem:[%s4490_s0 + $0x190] sm:$0xff] }
 0x1cd   :  { %v668_v38 = vpop.f32.mrb[90].mxu0  ;;  %v2349_v56 = vpack.c.bf16 %v2613_v54, %v2611_v7  ;;  %v2651_v7 = vld [vmem:[%s4490_s0 + $0x138] sm:$0xff] }
 0x1ce   :  { %v669_v28 = vadd.f32 %v3701_v6, %v668_v38  ;;  %v670_v5 = vpop.f32.mrb[91].mxu0  ;;  %2618 = vtanh.f32 %v969_v19  ;;  %v2390_v54 = vpack.c.bf16 %v2651_v7, %v2650_v58  ;;  %v2652_v19 = vld [vmem:[%s4490_s0 + $0x158] sm:$0xff]  ;;  %v2653_v38 = vld [vmem:[%s4490_s0 + $0x170] sm:$0xff] }
 0x1cf   :  { %v2655_v5 = vld [vmem:[%s4490_s0 + $0x168] sm:$0xff]  ;;  %v4601_v7 = vld [vmem:[#allocation14_spill] sm:$0xff] }
 0x1d0   :  { %v974_v22 = vadd.f32 %v3808_v33, %v669_v28  ;;  %2351 = vmatpush3.bf16.xpose.msk.msra.mxu1 %vm3857_vm1, %v2349_v56  ;;  %v2615_v47 = vpop.eup %2614  ;;  %v2392_v56 = vpack.c.bf16 %v2653_v38, %v2652_v19  ;;  %v2654_v28 = vld [vmem:[%s4490_s0 + $0x150] sm:$0xff] }
 0x1d1   :  { %v673_v60 = vpop.f32.mrb[92].mxu0  ;;  %2352 = vmatprep.subr.bf16.mxu1 %v4588_v49 }
 0x1d2   :  { %2620 = vtanh.f32 %v974_v22  ;;  %v674_v50 = vadd.f32 %v3701_v6, %v673_v60  ;;  %v675_v1 = vpop.f32.mrb[93].mxu0  ;;  %v2394_v22 = vpack.c.bf16 %v2655_v5, %v2654_v28  ;;  %v2656_v60 = vld [vmem:[%s4490_s0 + $0x188] sm:$0xff]  ;;  %v36_v28 = vlaneseq }
 0x1d4   :  { %v2617_v0 = vpop.eup %2616  ;;  %v979_v53 = vadd.f32 %v3827_v55, %v674_v50  ;;  %v2657_v50 = vld [vmem:[%s4490_s0 + $0x1a0] sm:$0xff]  ;;  %v1043_v5 = vshrl.u32 %v36_v28, 7  ;;  %vm1378_vm5 = vcmp.lt.s32.totalorder %v36_v28, 384  ;;  %vm4281_vm7 = vcmp.lt.s32.totalorder %v36_v28, 320 }
 0x1d5   :  { %v678_v48 = vpop.f32.mrb[94].mxu0  ;;  %v2353_v52 = vpack.c.bf16 %v2617_v0, %v2615_v47  ;;  %v2396_v1 = vpack.c.bf16 %v2657_v50, %v2656_v60  ;;  %v2658_v47 = vld [vmem:[%s4490_s0 + $0x180] sm:$0xff]  ;;  %v2659_v0 = vld [vmem:[%s4490_s0 + $0x198] sm:$0xff]  ;;  %v2834_v50 = vmov 1966171168  }
 0x1d6   :  { %v679_v36 = vadd.f32 %v3701_v6, %v678_v48  ;;  %v680_v33 = vpop.f32.mrb[95].mxu0  ;;  %2622 = vtanh.f32 %v979_v53  ;;  %v2398_v53 = vpack.c.bf16 %v2659_v0, %v2658_v47  ;;  %v2660_v48 = vld [vmem:[%s4490_s0 + $0x1b8] sm:$0xff]  ;;  %v1335_v0 = vand.u32 127, %v36_v28  ;;  %40 = vst.msk [vmem:[#allocation8] sm:$0x7] %vm4281_vm7, %v2833_v59 }
 0x1d7   :  { %v2662_v33 = vld [vmem:[%s4490_s0 + $0x1b0] sm:$0xff] }
 0x1d8   :  { %v984_v30 = vadd.f32 %v3822_v15, %v679_v36  ;;  %2355 = vmatpush3.bf16.xpose.msk.msra.mxu1 %vm3857_vm1, %v2353_v52  ;;  %v2619_v24 = vpop.eup %2618  ;;  %v4589_v15 = vpack.c.bf16 %v2951_v26, %v2946_v25  ;;  %v2635_v25 = vld [vmem:[%s4490_s0 + $0x78] sm:$0xff]  ;;  %v2661_v52 = vld [vmem:[%s4490_s0 + $0x1d0] sm:$0xff] }
 0x1d9   :  { %2356 = vmatprep.subr.bf16.mxu1 %v4588_v49  ;;  %v2374_v26 = vpack.c.bf16 %v2635_v25, %v2634_v31  ;;  %v2400_v36 = vpack.c.bf16 %v2661_v52, %v2660_v48  ;;  %v2672_v25 = vld [vmem:[%s4490_s0 + $0x248] sm:$0xff] }
 0x1da   :  { %2624 = vtanh.f32 %v984_v30  ;;  %v2663_v30 = vld [vmem:[%s4490_s0 + $0x1c8] sm:$0xff] }
 0x1dc   :  { %v2621_v46 = vpop.eup %2620 }
 0x1dd   :  { %v2357_v14 = vpack.c.bf16 %v2621_v46, %v2619_v24  ;;  %v2402_v24 = vpack.c.bf16 %v2663_v30, %v2662_v33  ;;  %v2664_v46 = vld [vmem:[%s4490_s0 + $0x1e8] sm:$0xff] }
 0x1e0   :  { %2359 = vmatpush3.bf16.xpose.msk.msra.mxu1 %vm3857_vm1, %v2357_v14  ;;  %v2623_v55 = vpop.eup %2622  ;;  %v2665_v14 = vld [vmem:[%s4490_s0 + $0x200] sm:$0xff] }
 0x1e1   :  { %2360 = vmatprep.subr.bf16.mxu1 %v4588_v49 }
 0x1e4   :  { %v2625_v6 = vpop.eup %2624 }
 0x1e5   :  { %v2361_v2 = vpack.c.bf16 %v2625_v6, %v2623_v55  ;;  %v2404_v55 = vpack.c.bf16 %v2665_v14, %v2664_v46  ;;  %v2666_v6 = vld [vmem:[%s4490_s0 + $0x1e0] sm:$0xff] }
 0x1e8   :  { %2363 = vmatpush3.bf16.xpose.msk.msra.mxu1 %vm3857_vm1, %v2361_v2  ;;  %v2667_v2 = vld [vmem:[%s4490_s0 + $0x1f8] sm:$0xff] }
 0x1e9   :  { %2365 = vmatprep.subr.bf16.mxu1 %v4589_v15  ;;  %v2406_v15 = vpack.c.bf16 %v2667_v2, %v2666_v6 }
 0x1eb   :  { %v1040_v60 = vpop.permute.xlu0 %1039 }
 0x1ef   :  { %2183 = vmatmul.mubr.msk.f32.vlgmr.msra.gmra.mrb[50].mxu1 %vm232_vm0, %v3741_v9  ;;  %v4597_v9 = vpack.c.bf16 %v4595_v32, %v4596_v29  ;;  %v2674_v29 = vld [vmem:[%s4490_s0 + $0x240] sm:$0xff] }
 0x1f0   :  { %2367 = vmatpush1.bf16.msra.mxu1 %v4591_v17  ;;  %v2669_v17 = vld [vmem:[%s4490_s0 + $0x230] sm:$0xff] }
 0x1f1   :  { %2369 = vmatprep.subr.bf16.mxu1 %v4594_v3  ;;  %v2408_v63 = vpack.c.bf16 %v2669_v17, %v2668_v62  ;;  %v2671_v3 = vld [vmem:[%s4490_s0 + $0x228] sm:$0xff] }
 0x1f2   :  { %v2410_v31 = vpack.c.bf16 %v2671_v3, %v2670_v57 }
 0x1f4   :  { %2371 = vmatpush1.bf16.msra.mxu1 %v4597_v9  ;;  %v2675_v9 = vld [vmem:[%s4490_s0 + $0x258] sm:$0xff] }
 0x1f5   :  { %2373 = vmatprep.subr.bf16.mxu1 %v4600_v41  ;;  %v2414_v37 = vpack.c.bf16 %v2675_v9, %v2674_v29  ;;  %v2679_v41 = vld [vmem:[%s4490_s0 + $0x288] sm:$0xff]  ;;  %v4604_v9 = vld [vmem:[#allocation18_spill] sm:$0xff] }
 0x1f6   :  { %v2418_v21 = vpack.c.bf16 %v2679_v41, %v2678_v27  ;;  %v2696_v41 = vld [vmem:[%s4490_s0 + $0x220] sm:$0xff] }
 0x1f8   :  { %2375 = vmatpush1.bf16.msra.mxu1 %v2374_v26  ;;  %v2673_v26 = vld [vmem:[%s4490_s0 + $0x260] sm:$0xff] }
 0x1f9   :  { %2377 = vmatprep.subr.bf16.mxu1 %v2376_v16  ;;  %v2412_v32 = vpack.c.bf16 %v2673_v26, %v2672_v25  ;;  %v2677_v16 = vld [vmem:[%s4490_s0 + $0x290] sm:$0xff]  ;;  %v2835_v25 = vmov -inf   ;;  %v2692_v26 = vld [vmem:[%s4490_s0 + $0x1c0] sm:$0xff] }
 0x1fa   :  { %v2416_v40 = vpack.c.bf16 %v2677_v16, %v2676_v10  ;;  %34 = vst.msk [vmem:[#allocation5] sm:$0x1] %vm33_vm6, %v2835_v25  ;;  %v2694_v16 = vld [vmem:[%s4490_s0 + $0x1f0] sm:$0xff] }
 0x1fc   :  { %2379 = vmatpush1.bf16.msra.mxu1 %v2378_v34  ;;  %v2681_v34 = vld [vmem:[%s4490_s0 + $0x2c0] sm:$0xff] }
 0x1fd   :  { %2381 = vmatprep.subr.bf16.mxu1 %v2380_v20  ;;  %v2420_v13 = vpack.c.bf16 %v2681_v34, %v2680_v4  ;;  %v2683_v20 = vld [vmem:[%s4490_s0 + $0x2b8] sm:$0xff]  ;;  %v4607_v34 = vld [vmem:[#allocation24_spill] sm:$0xff] }
 0x1fe   :  { %v2422_v61 = vpack.c.bf16 %v2683_v20, %v2682_v35  ;;  %v2698_v20 = vld [vmem:[%s4490_s0 + $0x250] sm:$0xff] }
 0x200   :  { %2383 = vmatpush1.bf16.msra.mxu1 %v2382_v44  ;;  %v2685_v44 = vld [vmem:[%s4490_s0 + $0x2f0] sm:$0xff] }
 0x201   :  { %2385 = vmatprep.subr.bf16.mxu1 %v2384_v8  ;;  %v2424_v23 = vpack.c.bf16 %v2685_v44, %v2684_v43  ;;  %v2687_v8 = vld [vmem:[%s4490_s0 + $0x2e8] sm:$0xff]  ;;  %v4610_v44 = vld [vmem:[#allocation27_spill] sm:$0xff] }
 0x202   :  { %v2426_v39 = vpack.c.bf16 %v2687_v8, %v2686_v11  ;;  %v2700_v8 = vld [vmem:[%s4490_s0 + $0x280] sm:$0xff] }
 0x204   :  { %2387 = vmatpush1.bf16.msra.mxu1 %v2386_v51  ;;  %v2689_v51 = vld [vmem:[%s4490_s0 + $0x320] sm:$0xff] }
 0x205   :  { %2389 = vmatprep.subr.bf16.mxu1 %v2388_v42  ;;  %v2428_v45 = vpack.c.bf16 %v2689_v51, %v2688_v18  ;;  %v2691_v42 = vld [vmem:[%s4490_s0 + $0x1a8] sm:$0xff] }
 0x206   :  { %v2460_v58 = vpack.c.bf16 %v2691_v42, %v2690_v12  ;;  %v4613_v51 = vld [vmem:[#allocation29_spill] sm:$0xff]  ;;  %v4616_v42 = vld [vmem:[#allocation31_spill] sm:$0xff] }
 0x208   :  { %2391 = vmatpush1.bf16.msra.mxu1 %v2390_v54  ;;  %2461 = vmatprep.subr.bf16.mxu0 %v2460_v58  ;;  %v4602_v54 = vld [vmem:[#allocation13_spill] sm:$0xff]  ;;  %v4617_v58 = vld [vmem:[#allocation30_spill] sm:$0xff] }
 0x209   :  { %2393 = vmatprep.subr.bf16.mxu1 %v2392_v56  ;;  %v4603_v19 = vpack.c.bf16 %v4601_v7, %v4602_v54  ;;  %v4618_v7 = vpack.c.bf16 %v4616_v42, %v4617_v58  ;;  %v1381_v54 = vld [vmem:[#allocation5] sm:$0x1]  ;;  %v2718_v58 = vld [vmem:[%s4490_s0 + $0x390] sm:$0xff] }
 0x20b   :  { %2463 = vmatpush3.bf16.msra.mxu0 %v4603_v19 }
 0x20c   :  { %2395 = vmatpush1.bf16.msra.mxu1 %v2394_v22  ;;  %v4194_v22 = vsub.s32 0, %v1043_v5 }
 0x20d   :  { %2397 = vmatprep.subr.bf16.mxu1 %v2396_v1  ;;  %v1354_v1 = vunpack.c.l.s4 %v2834_v50  ;;  %v2703_v50 = vld [vmem:[%s4490_s0 + $0x2c8] sm:$0xff] }
 0x20e   :  { %v1045_v47 = vrot.slane %v1040_v60, %v4194_v22  ;;  %v2702_v60 = vld [vmem:[%s4490_s0 + $0x2b0] sm:$0xff] }
 0x210   :  { %2399 = vmatpush1.bf16.msra.mxu1 %v2398_v53  ;;  %v1355_v53 = vunpack.c.0.s8 %v1354_v1  ;;  %v2484_v1 = vpack.c.bf16 %v2703_v50, %v2702_v60  ;;  %v2721_v60 = vld [vmem:[%s4490_s0 + $0x3e0] sm:$0xff] }
 0x211   :  { %2401 = vmatprep.subr.bf16.mxu1 %v2400_v36  ;;  %v1337_v36 = vadd.s32 256, %v1335_v0  ;;  %v2705_v0 = vld [vmem:[%s4490_s0 + $0x2f8] sm:$0xff] }
 0x212   :  { %v4202_v33 = vsub.s32 %v1355_v53, %v1043_v5 }
 0x213   :  { %vm1345_vm4 = vcmp.lt.s32.totalorder %v1337_v36, 300 }
 0x214   :  { %2403 = vmatpush1.bf16.msra.mxu1 %v2402_v24 }
 0x215   :  { %2405 = vmatprep.subr.bf16.mxu1 %v2404_v55 }
 0x218   :  { %2407 = vmatpush1.bf16.msra.mxu1 %v2406_v15 }
 0x219   :  { %2409 = vmatprep.subr.bf16.mxu1 %v2408_v63 }
 0x21c   :  { %2411 = vmatpush1.bf16.msra.mxu1 %v2410_v31 }
 0x21d   :  { %2413 = vmatprep.subr.bf16.mxu1 %v2412_v32  ;;  %v2693_v32 = vld [vmem:[%s4490_s0 + $0x1d8] sm:$0xff] }
 0x21e   :  { %v2464_v29 = vpack.c.bf16 %v2693_v32, %v2692_v26  ;;  %v2706_v32 = vld [vmem:[%s4490_s0 + $0x300] sm:$0xff] }
 0x220   :  { %2415 = vmatpush1.bf16.msra.mxu1 %v2414_v37  ;;  %2465 = vmatprep.subr.bf16.mxu0 %v2464_v29  ;;  %v4605_v37 = vld [vmem:[#allocation17_spill] sm:$0xff]  ;;  %v2707_v29 = vld [vmem:[%s4490_s0 + $0x318] sm:$0xff] }
 0x221   :  { %2417 = vmatprep.subr.bf16.mxu1 %v2416_v40  ;;  %v4606_v10 = vpack.c.bf16 %v4604_v9, %v4605_v37  ;;  %v2695_v40 = vld [vmem:[%s4490_s0 + $0x208] sm:$0xff] }
 0x222   :  { %v2468_v27 = vpack.c.bf16 %v2695_v40, %v2694_v16 }
 0x223   :  { %2467 = vmatpush3.bf16.msra.mxu0 %v4606_v10 }
 0x224   :  { %2419 = vmatpush1.bf16.msra.mxu1 %v2418_v21  ;;  %v2697_v21 = vld [vmem:[%s4490_s0 + $0x238] sm:$0xff]  ;;  %2469 = vmatprep.subr.bf16.mxu0 %v2468_v27 }
 0x225   :  { %2421 = vmatprep.subr.bf16.mxu1 %v2420_v13  ;;  %v2472_v4 = vpack.c.bf16 %v2697_v21, %v2696_v41  ;;  %v4608_v13 = vld [vmem:[#allocation23_spill] sm:$0xff]  ;;  %v2710_v41 = vld [vmem:[%s4490_s0 + $0x330] sm:$0xff]  ;;  %v2711_v21 = vld [vmem:[%s4490_s0 + $0x348] sm:$0xff] }
 0x226   :  { %v4609_v35 = vpack.c.bf16 %v4607_v34, %v4608_v13  ;;  %v4627_v34 = vld [vmem:[#allocation37_spill] sm:$0xff]  ;;  %v4628_v13 = vld [vmem:[#allocation36_spill] sm:$0xff] }
 0x228   :  { %2423 = vmatpush1.bf16.msra.mxu1 %v2422_v61  ;;  %2471 = vmatpush3.bf16.msra.mxu0 %v4609_v35  ;;  %v2699_v61 = vld [vmem:[%s4490_s0 + $0x268] sm:$0xff]  ;;  %v4629_v35 = vpack.c.bf16 %v4627_v34, %v4628_v13  ;;  %v4648_v13 = vld [vmem:[#allocation51_spill] sm:$0xff] }
 0x229   :  { %2425 = vmatprep.subr.bf16.mxu1 %v2424_v23  ;;  %2473 = vmatprep.subr.bf16.mxu0 %v2472_v4  ;;  %v2476_v43 = vpack.c.bf16 %v2699_v61, %v2698_v20  ;;  %v4611_v23 = vld [vmem:[#allocation26_spill] sm:$0xff]  ;;  %v2434_v4 = vpack.c.bf16 %v2711_v21, %v2710_v41  ;;  %v2712_v61 = vld [vmem:[%s4490_s0 + $0x368] sm:$0xff] }
 0x22a   :  { %v4612_v11 = vpack.c.bf16 %v4610_v44, %v4611_v23  ;;  %v4645_v21 = vld [vmem:[#allocation49_spill] sm:$0xff] }
 0x22c   :  { %2427 = vmatpush1.bf16.msra.mxu1 %v2426_v39  ;;  %2475 = vmatpush3.bf16.msra.mxu0 %v4612_v11  ;;  %v2701_v39 = vld [vmem:[%s4490_s0 + $0x298] sm:$0xff]  ;;  %v2714_v11 = vld [vmem:[%s4490_s0 + $0x360] sm:$0xff] }
 0x22d   :  { %2429 = vmatprep.subr.bf16.mxu1 %v2428_v45  ;;  %2477 = vmatprep.subr.bf16.mxu0 %v2476_v43  ;;  %v2480_v18 = vpack.c.bf16 %v2701_v39, %v2700_v8  ;;  %v4614_v45 = vld [vmem:[#allocation28_spill] sm:$0xff]  ;;  %v2715_v8 = vld [vmem:[%s4490_s0 + $0x378] sm:$0xff] }
 0x22e   :  { %v4615_v12 = vpack.c.bf16 %v4613_v51, %v4614_v45  ;;  %v2713_v43 = vld [vmem:[%s4490_s0 + $0x380] sm:$0xff]  ;;  %v2438_v39 = vpack.c.bf16 %v2715_v8, %v2714_v11  ;;  %v4631_v51 = vld [vmem:[#allocation38_spill] sm:$0xff] }
 0x22f   :  { %v2436_v44 = vpack.c.bf16 %v2713_v43, %v2712_v61 }
 0x230   :  { %2479 = vmatpush3.bf16.msra.mxu0 %v4615_v12  ;;  %v2716_v12 = vld [vmem:[%s4490_s0 + $0x398] sm:$0xff] }
 0x231   :  { %2481 = vmatprep.subr.bf16.mxu0 %v2480_v18  ;;  %v4630_v18 = vld [vmem:[#allocation39_spill] sm:$0xff] }
 0x232   :  { %v4632_v45 = vpack.c.bf16 %v4630_v18, %v4631_v51 }
 0x234   :  { %2483 = vmatpush3.bf16.msra.mxu0 %v4618_v7  ;;  %v2719_v7 = vld [vmem:[%s4490_s0 + $0x3a8] sm:$0xff] }
 0x235   :  { %2485 = vmatprep.subr.bf16.mxu0 %v2484_v1  ;;  %v2722_v1 = vld [vmem:[%s4490_s0 + $0x3c0] sm:$0xff] }
 0x282   :  { %v1259_v38 = vpop.f32.mrb[48].mxu1 }
 0x283   :  { %v1261_v56 = vpop.f32.mrb[49].mxu1  ;;  %v4198_v48 = vadd.f32 %v1259_v38, %v1045_v47 }
 0x284   :  { %v4200_v52 = vadd.f32 %v1261_v56, %v1045_v47 }
 0x285   :  { %v1383_v46 = vsel %vm1382_vm3, %v4198_v48, -inf }
 0x286   :  { %v1352_v30 = vcombine.low %v4198_v48, %v4200_v52  ;;  %v1384_v14 = vsel %vm1382_vm3, %v4200_v52, -inf }
 0x287   :  { %v1386_v15 = vmax.f32 %v1383_v46, %v1384_v14 }
 0x288   :  { %v1359_v63 = vrot.slane %v1352_v30, %v4202_v33  ;;  %v4621_v30 = vld [vmem:[#allocation33_spill] sm:$0xff] }
 0x2c2   :  { %v1330_v24 = vpop.f32.mrb[50].mxu1 }
 0x2c3   :  { %v1331_v55 = vadd.f32 %v1330_v24, %v1045_v47  ;;  %v2184_v6 = vpop.f32.mrb[51].mxu1  ;;  %v2704_v47 = vld [vmem:[%s4490_s0 + $0x2e0] sm:$0xff] }
 0x2c4   :  { %v2488_v53 = vpack.c.bf16 %v2705_v0, %v2704_v47  ;;  %v4622_v24 = vld [vmem:[#allocation32_spill] sm:$0xff]  ;;  %v4625_v6 = vld [vmem:[#allocation34_spill] sm:$0xff] }
 0x2c5   :  { %v4210_v2 = vsel %vm1345_vm4, %v1331_v55, -inf  ;;  %v4623_v46 = vpack.c.bf16 %v4621_v30, %v4622_v24  ;;  %v4624_v55 = vld [vmem:[#allocation35_spill] sm:$0xff]  ;;  %v4637_v30 = vld [vmem:[#allocation42_spill] sm:$0xff] }
 0x2c6   :  { %v1366_v62 = vrot.slane %v4210_v2, %v4202_v33  ;;  %v1385_v17 = vsel %vm1382_vm3, %v4210_v2, -inf  ;;  %v4626_v28 = vpack.c.bf16 %v4624_v55, %v4625_v6  ;;  %v2723_v47 = vld [vmem:[%s4490_s0 + $0x3d8] sm:$0xff]  ;;  %v2725_v55 = vld [vmem:[%s4490_s0 + $0x410] sm:$0xff] }
 0x2c7   :  { %v1387_v57 = vmax.f32 %v1386_v15, %v1385_v17  ;;  %2487 = vmatpush3.bf16.msra.mxu0 %v4623_v46  ;;  %v2446_v0 = vpack.c.bf16 %v2723_v47, %v2722_v1  ;;  %v2724_v46 = vld [vmem:[%s4490_s0 + $0x3f8] sm:$0xff] }
 0x2c8   :  { %v1367_v3 = vcombine.low %v1359_v63, %v1366_v62  ;;  %2489 = vmatprep.subr.bf16.mxu0 %v2488_v53  ;;  %v4636_v53 = vld [vmem:[#allocation43_spill] sm:$0xff]  ;;  %v2448_v6 = vpack.c.bf16 %v2725_v55, %v2724_v46 }
 0x2c9   :  { %1388 = vmax.xlane.f32.xlu0 %v1387_v57  ;;  %v4638_v24 = vpack.c.bf16 %v4636_v53, %v4637_v30 }
 0x2ca   :  { %v1374_v31 = vrot.slane %v1367_v3, %v4202_v33 }
 0x2cb   :  { %2491 = vmatpush3.bf16.msra.mxu0 %v4626_v28  ;;  %v2726_v28 = vld [vmem:[%s4490_s0 + $0x3f0] sm:$0xff] }
 0x2cc   :  { %1380 = vst.msk [vmem:[#allocation3] sm:$0x7] %vm1378_vm5, %v1374_v31  ;;  %2492 = vmatprep.subr.bf16.mxu0 %v4588_v49 }
 0x356   :  { %v1389_v19 = vpop.xlane.xlu0 %1388 }
 0x357   :  { %v1390_v38 = vmax.f32 %v1381_v54, %v1389_v19  ;;  %v4633_v19 = vld [vmem:[#allocation41_spill] sm:$0xff] }
 0x359   :  { %v1391_v56 = vsub.f32 %v1381_v54, %v1390_v38  ;;  %1748 = vst.msk [vmem:[#allocation5] sm:$0x1] %vm33_vm6, %v1390_v38  ;;  %1396 = vperm.xlu1 %2529, %v1390_v38   ;;  %v2442_v54 = vpack.c.bf16 %v2719_v7, %v2718_v58  ;;  %v4634_v38 = vld [vmem:[#allocation40_spill] sm:$0xff] }
 0x35b   :  { %v1392_v5 = vmul.f32 1.442695, %v1391_v56  ;;  %v4635_v56 = vpack.c.bf16 %v4633_v19, %v4634_v38 }
 0x35d   :  { %2626 = vpow2.f32 %v1392_v5  ;;  %v2720_v5 = vld [vmem:[%s4490_s0 + $0x3c8] sm:$0xff] }
 0x35e   :  { %v2444_v50 = vpack.c.bf16 %v2721_v60, %v2720_v5 }
 0x367   :  { %v4291_v14 = vpop.eup %2626 }
 0x368   :  { %1427 = vperm.xlu0 %2528, %v4291_v14  }
 0x3d8   :  { %v1397_v15 = vpop.permute.xlu1 %1396 }
 0x3d9   :  { %v1402_v62 = vrot.slane %v1397_v15, %v4194_v22  ;;  %v2727_v15 = vld [vmem:[%s4490_s0 + $0x408] sm:$0xff] }
 0x3db   :  { %v1403_v17 = vsub.f32 %v4198_v48, %v1402_v62  ;;  %v1404_v63 = vsub.f32 %v4200_v52, %v1402_v62  ;;  %v1405_v57 = vsub.f32 %v4210_v2, %v1402_v62  ;;  %v2430_v48 = vpack.c.bf16 %v2707_v29, %v2706_v32  ;;  %v2708_v52 = vld [vmem:[%s4490_s0 + $0x338] sm:$0xff]  ;;  %v2709_v2 = vld [vmem:[%s4490_s0 + $0x350] sm:$0xff] }
 0x3dc   :  { %v2432_v37 = vpack.c.bf16 %v2709_v2, %v2708_v52  ;;  %v2450_v62 = vpack.c.bf16 %v2727_v15, %v2726_v28  ;;  %v2731_v32 = vld [vmem:[%s4490_s0 + $0x438] sm:$0xff] }
 0x3dd   :  { %v1406_v3 = vmul.f32 1.442695, %v1403_v17  ;;  %v1408_v31 = vmul.f32 1.442695, %v1404_v63  ;;  %v1410_v25 = vmul.f32 1.442695, %v1405_v57 }
 0x3de   :  { %v4639_v17 = vld [vmem:[#allocation45_spill] sm:$0xff]  ;;  %v4640_v63 = vld [vmem:[#allocation44_spill] sm:$0xff]  ;;  %v2732_v2 = vld [vmem:[%s4490_s0 + $0x458] sm:$0xff] }
 0x3df   :  { %2628 = vpow2.f32 %v1406_v3  ;;  %v4641_v57 = vpack.c.bf16 %v4639_v17, %v4640_v63  ;;  %v2728_v3 = vld [vmem:[%s4490_s0 + $0x428] sm:$0xff] }
 0x3e0   :  { %2630 = vpow2.f32 %v1408_v31  ;;  %v2729_v31 = vld [vmem:[%s4490_s0 + $0x440] sm:$0xff] }
 0x3e1   :  { %2632 = vpow2.f32 %v1410_v25  ;;  %v2452_v25 = vpack.c.bf16 %v2729_v31, %v2728_v3 }
 0x3e9   :  { %v2629_v26 = vpop.eup %2628 }
 0x3ea   :  { %v2631_v9 = vpop.eup %2630  ;;  %v1414_v10 = vsel %vm1382_vm3, %v2629_v26, 0.0 }
 0x3eb   :  { %v4315_v16 = vpop.eup %2632  ;;  %1499 = vmatprep.mubr.f32.mxu1 %v2631_v9  ;;  %1641 = vmatprep.mubr.f32.mxu0 %v2631_v9  ;;  %v1415_v40 = vsel %vm1382_vm3, %v2631_v9, 0.0  ;;  %v4643_v9 = vld [vmem:[#allocation46_spill] sm:$0xff] }
 0x3ec   :  { %1500 = vmatmul.mubr.f32.vlgmr.msra.gmra.mrb[52].mxu1 %v2629_v26  ;;  %1642 = vmatmul.mubr.f32.vlgmr.msra.gmra.mrb[96].mxu0 %v2629_v26  ;;  %v1416_v27 = vadd.f32 %v1415_v40, %v1414_v10  ;;  %v1417_v20 = vsel %vm1382_vm3, %v4315_v16, 0.0  ;;  %v2730_v26 = vld [vmem:[%s4490_s0 + $0x420] sm:$0xff]  ;;  %v2734_v40 = vld [vmem:[%s4490_s0 + $0x450] sm:$0xff] }
 0x3ed   :  { %2431 = vmatpush1.bf16.msra.mxu1 %v2430_v48  ;;  %2494 = vmatpush3.bf16.msra.mxu0 %v4629_v35  ;;  %v2454_v29 = vpack.c.bf16 %v2731_v32, %v2730_v26  ;;  %v4642_v48 = vld [vmem:[#allocation47_spill] sm:$0xff]  ;;  %v4649_v35 = vld [vmem:[#allocation50_spill] sm:$0xff] }
 0x3ee   :  { %2433 = vmatprep.subr.bf16.mxu1 %v2432_v37  ;;  %2495 = vmatprep.subr.bf16.mxu0 %v4588_v49  ;;  %v1418_v23 = vadd.f32 %v1417_v20, %v1416_v27  ;;  %v4644_v52 = vpack.c.bf16 %v4642_v48, %v4643_v9  ;;  %v2733_v37 = vld [vmem:[%s4490_s0 + $0x470] sm:$0xff]  ;;  %v2735_v27 = vld [vmem:[%s4490_s0 + $0x468] sm:$0xff]  ;;  %v4650_v20 = vpack.c.bf16 %v4648_v13, %v4649_v35 }
 0x3ef   :  { %1570 = vmatprep.mubr.f32.mxu1 %v2833_v59  ;;  %2217 = vmatprep.mubr.msk.f32.mxu0 %vm2832_vm2, %v2833_v59  ;;  %v2717_v59 = vld [vmem:[%s4490_s0 + $0x3b0] sm:$0xff]  ;;  %v2456_v10 = vpack.c.bf16 %v2733_v37, %v2732_v2  ;;  %v2458_v41 = vpack.c.bf16 %v2735_v27, %v2734_v40  ;;  %s1765_s0 = sshll.u32 %s2836_s19, 4  ;;  %s1766_s0 = int_to_ptr.vmem [resolvable:$true] %s1765_s0 }
 0x3f0   :  { %1419 = vadd.xlane.f32.xlu1 %v1418_v23  ;;  %v2440_v42 = vpack.c.bf16 %v2717_v59, %v2716_v12  ;;  %s2736_s21 = scalar_lea.vmem %s1766_s0, 16  ;;  %s2740_s3 = scalar_lea.vmem %s1766_s0, 32 }
 0x3f1   :  { %2435 = vmatpush1.bf16.msra.mxu1 %v2434_v4  ;;  %2497 = vmatpush3.bf16.msra.mxu0 %v4632_v45  ;;  %v4646_v4 = vld [vmem:[#allocation48_spill] sm:$0xff]  ;;  %p2737_p0 = scmp.ne.s32.totalorder %s1766_s0, %s2736_s21  ;;  %p2741_p1 = scmp.lt.s32.totalorder %s1766_s0, %s1766_s0 }
 0x3f2   :  { %2437 = vmatprep.subr.bf16.mxu1 %v2436_v44  ;;  %2498 = vmatprep.subr.bf16.mxu0 %v4588_v49  ;;  %v4647_v34 = vpack.c.bf16 %v4645_v21, %v4646_v4  ;;  %p2742_p2 = scmp.lt.s32.totalorder %s2740_s3, %s2736_s21 }
 0x3f4   :  { %p2743_p3 = por %p2742_p2, %p2741_p1 }
 0x3f5   :  { %2439 = vmatpush1.bf16.msra.mxu1 %v2438_v39  ;;  %2500 = vmatpush3.bf16.msra.mxu0 %v4635_v56 }
 0x3f6   :  { %2441 = vmatprep.subr.bf16.mxu1 %v2440_v42  ;;  %2501 = vmatprep.subr.bf16.mxu0 %v4588_v49  ;;  %p2744_p4 = pnand %p2743_p3, %p2737_p0 }
 0x3f9   :  { %2443 = vmatpush1.bf16.msra.mxu1 %v2442_v54  ;;  %2503 = vmatpush3.bf16.msra.mxu0 %v4638_v24 }
 0x3fa   :  { %2445 = vmatprep.subr.bf16.mxu1 %v2444_v50  ;;  %2504 = vmatprep.subr.bf16.mxu0 %v4588_v49 }
 0x3fd   :  { %2447 = vmatpush1.bf16.msra.mxu1 %v2446_v0  ;;  %2506 = vmatpush3.bf16.msra.mxu0 %v4641_v57 }
 0x3fe   :  { %2449 = vmatprep.subr.bf16.mxu1 %v2448_v6  ;;  %2507 = vmatprep.subr.bf16.mxu0 %v4588_v49 }
 0x401   :  { %2451 = vmatpush1.bf16.msra.mxu1 %v2450_v62  ;;  %2509 = vmatpush3.bf16.msra.mxu0 %v4644_v52 }
 0x402   :  { %2453 = vmatprep.subr.bf16.mxu1 %v2452_v25  ;;  %2510 = vmatprep.subr.bf16.mxu0 %v4588_v49 }
 0x405   :  { %2455 = vmatpush1.bf16.msra.mxu1 %v2454_v29  ;;  %2512 = vmatpush3.bf16.msra.mxu0 %v4647_v34 }
 0x406   :  { %2457 = vmatprep.subr.bf16.mxu1 %v2456_v10  ;;  %2513 = vmatprep.subr.bf16.mxu0 %v4588_v49 }
 0x409   :  { %2459 = vmatpush1.bf16.msra.mxu1 %v2458_v41  ;;  %2515 = vmatpush3.bf16.msra.mxu0 %v4650_v20 }
 0x40c   :  { %1571 = vmatmul.mubr.f32.vlgmr.msra.gmra.mrb[52].mxu1 %v4315_v16  ;;  %2218 = vmatmul.mubr.f32.vlgmr.msra.gmra.mrb[98].mxu0 %v4315_v16 }
 0x40d   :  { %2747 = shalt.err (!%p2744_p4)
}
 0x40e   :  { %s2748_s24 = scalar_lea.hbm %s4496_s6, 16 }
 0x40f   :  { %p2749_p5 = scmp.ne.s32.totalorder %s4496_s6, %s2748_s24  ;;  %p2752_p6 = scmp.lt.u32.totalorder %s2748_s24, %s4496_s6 }
 0x411   :  { %p2754_p7 = pnand %p2752_p6, %p2749_p5 }
 0x413   :  { %2757 = shalt.err (!%p2754_p7)
}
 0x414   :  { %1768 = dma.vmem_to_hbm [thread:$0]  %s1766_s0, 16, %s4496_s6, [#allocation6]  }
 0x415   :  { %s2758_s30 = scalar_lea.vmem %s1756_s2, 48  ;;  %s2762_s9 = scalar_lea.vmem %s1756_s2, 64 }
 0x416   :  { %p2759_p8 = scmp.ne.s32.totalorder %s1756_s2, %s2758_s30  ;;  %p2763_p9 = scmp.lt.s32.totalorder %s1756_s2, %s1756_s2 }
 0x417   :  { %p2764_p10 = scmp.lt.s32.totalorder %s2762_s9, %s2758_s30 }
 0x419   :  { %p2765_p11 = por %p2764_p10, %p2763_p9 }
 0x41b   :  { %p2766_p12 = pnand %p2765_p11, %p2759_p8 }
 0x41d   :  { %2769 = shalt.err (!%p2766_p12)
}
 0x41e   :  { %s2770_s12 = scalar_lea.hbm %s4495_s5, 48 }
 0x41f   :  { %p2771_p13 = scmp.ne.s32.totalorder %s4495_s5, %s2770_s12  ;;  %p2774_p0 = scmp.lt.u32.totalorder %s2770_s12, %s4495_s5 }
 0x421   :  { %p2776_p1 = pnand %p2774_p0, %p2771_p13 }
 0x423   :  { %2779 = shalt.err (!%p2776_p1)
}
 0x424   :  { %1758 = dma.vmem_to_hbm [thread:$0]  %s1756_s2, 48, %s4495_s5, [#allocation4]   ;;  %v1412_v49 = vld [vmem:[#allocation7] sm:$0x1] }
 0x425   :  { %s2838_s17 = smov [#allocation7]   ;;  %v1413_v16 = vmul.f32 %v4291_v14, %v1412_v49 }
 0x426   :  { %s1775_s18 = sshll.u32 %s2838_s17, 4  ;;  %s1776_s18 = int_to_ptr.vmem [resolvable:$true] %s1775_s18 }
 0x427   :  { %s2780_s19 = scalar_lea.vmem %s1776_s18, 16  ;;  %s2784_s0 = scalar_lea.vmem %s1776_s18, 32 }
 0x428   :  { %p2781_p2 = scmp.ne.s32.totalorder %s1776_s18, %s2780_s19  ;;  %p2785_p3 = scmp.lt.s32.totalorder %s1776_s18, %s1776_s18 }
 0x429   :  { %p2786_p4 = scmp.lt.s32.totalorder %s2784_s0, %s2780_s19 }
 0x42b   :  { %p2787_p5 = por %p2786_p4, %p2785_p3 }
 0x42d   :  { %p2788_p6 = pnand %p2787_p5, %p2781_p2 }
 0x47d   :  { %v1420_v61 = vpop.xlane.xlu1 %1419 }
 0x47e   :  { %v1421_v43 = vadd.f32 %v1420_v61, %v1413_v16 }
 0x480   :  { %1423 = vst.msk [vmem:[#allocation7] sm:$0x1] %vm33_vm6, %v1421_v43 }
 0x481   :  { %2791 = shalt.err (!%p2788_p6)
}
 0x482   :  { %s2792_s2 = scalar_lea.hbm %s4497_s7, 16 }
 0x483   :  { %p2793_p7 = scmp.ne.s32.totalorder %s4497_s7, %s2792_s2  ;;  %p2796_p8 = scmp.lt.u32.totalorder %s2792_s2, %s4497_s7 }
 0x485   :  { %p2798_p9 = pnand %p2796_p8, %p2793_p7 }
 0x487   :  { %2801 = shalt.err (!%p2798_p9)
}
 0x488   :  { %1778 = dma.vmem_to_hbm [thread:$0]  %s1776_s18, 16, %s4497_s7, [#allocation6]   ;;  %v1428_v11 = vpop.permute.xlu0 %1427  ;;  %v1424_v7 = vld [vmem:[#allocation8] sm:$0x7] }
 0x489   :  { %v1433_v42 = vrot.slane %v1428_v11, %v4194_v22  ;;  %s2839_s26 = smov [#allocation8]  }
 0x48a   :  { %s1785_s7 = sshll.u32 %s2839_s26, 4  ;;  %s1786_s7 = int_to_ptr.vmem [resolvable:$true] %s1785_s7 }
 0x48b   :  { %v1434_v19 = vmul.f32 %v1433_v42, %v1424_v7  ;;  %s2802_s27 = scalar_lea.vmem %s1786_s7, 48  ;;  %s2806_s28 = scalar_lea.vmem %s1786_s7, 64 }
 0x48c   :  { %p2803_p10 = scmp.ne.s32.totalorder %s1786_s7, %s2802_s27  ;;  %p2807_p11 = scmp.lt.s32.totalorder %s1786_s7, %s1786_s7 }
 0x48d   :  { %p2808_p12 = scmp.lt.s32.totalorder %s2806_s28, %s2802_s27 }
 0x48f   :  { %p2809_p13 = por %p2808_p12, %p2807_p11 }
 0x491   :  { %p2810_p0 = pnand %p2809_p13, %p2803_p10 }
 0x4bf   :  { %v2042_v14 = vpop.f32.mrb[96].mxu0 }
 0x4c0   :  { %v2043_v44 = vpop.f32.mrb[97].mxu0 }
 0x4c1   :  { %v2044_v23 = vadd.f32 %v2043_v44, %v2042_v14 }
 0x4df   :  { %v1572_v8 = vpop.f32.mrb[52].mxu1  ;;  %v1713_v39 = vpop.f32.mrb[98].mxu0 }
 0x4e0   :  { %v1714_v18 = vadd.f32 %v2044_v23, %v1713_v39  ;;  %v1574_v51 = vpop.f32.mrb[53].mxu1  ;;  %v2219_v45 = vpop.f32.mrb[99].mxu0 }
 0x4e1   :  { %v1720_v12 = vcombine.low %v1572_v8, %v1574_v51 }
 0x4e2   :  { %v1734_v59 = vrot.slane %v1714_v18, %v4202_v33 }
 0x4e3   :  { %v1727_v58 = vrot.slane %v1720_v12, %v4202_v33 }
 0x4e5   :  { %v1735_v54 = vcombine.low %v1727_v58, %v1734_v59 }
 0x4e7   :  { %v1742_v38 = vrot.slane %v1735_v54, %v4202_v33 }
 0x4e9   :  { %v1744_v56 = vadd.f32 %v1742_v38, %v1434_v19 }
 0x4eb   :  { %1747 = vst.msk [vmem:[#allocation8] sm:$0x7] %vm4281_vm7, %v1744_v56 }
 0x4ec   :  { %2813 = shalt.err (!%p2810_p0)
}
 0x4ed   :  { %s2814_s30 = scalar_lea.hbm %s4498_s8, 48 }
 0x4ee   :  { %p2815_p1 = scmp.ne.s32.totalorder %s4498_s8, %s2814_s30  ;;  %p2818_p2 = scmp.lt.u32.totalorder %s2814_s30, %s4498_s8 }
 0x4f0   :  { %p2820_p3 = pnand %p2818_p2, %p2815_p1 }
 0x4f2   :  { %2823 = shalt.err (!%p2820_p3)
}
 0x4f3   :  { %1788 = dma.vmem_to_hbm [thread:$0]  %s1786_s7, 48, %s4498_s8, [#allocation9]  }
 0x4f4   :  { %2824 = dma.done.wait [#allocation4], 48  }
 0x4f5   :  { %2825 = vsyncadd [#allocation4], 4294967248 }
 0x4f6   :  { %2826 = dma.done.wait [#allocation6], 32  }
 0x4f7   :  { %2827 = vsyncadd [#allocation6], 4294967264 }
 0x4f8   :  { %2828 = dma.done.wait [#allocation9], 48  }
 0x4f9   :  { %2829 = vsyncadd [#allocation9], 4294967248 }
 0x4fa   :  { %1801 = vsyncpa [#allocation4], 1 }
 0x4fb   :  { %1802 = vsyncpa [#allocation6], 1 }
 0x4fc   :  { %1803 = vsyncpa [#allocation9], 1 }

</bundles_post_ra>
